<compile_context>
chip_gen: v6e
topology: v6e:2x2x1
jax: 0.10.0
libtpu: 0.0.40
codegen_flags: <defaults>
</compile_context>

<pallas_src>
import functools

import jax
import jax.numpy as jnp
from jax.experimental import pallas as pl
from jax.experimental.pallas import tpu as pltpu

P = 128  # lane-dense padded block width (HC=32 -> 128, ncls=4 -> 128)


# ----------------------------------------------------------------------------
# Fused Pallas kernel: GAT layer 1 -> GAT layer 2 -> FC head
# ----------------------------------------------------------------------------
def _net2_kernel(x_ref, mask_ref, w_ref, b_ref, o_ref, *, H, C):
    """x_ref:    [N, P]      bf16  node features, zero-padded to 128 lanes
       mask_ref: [N, N]      bf16  additive adjacency mask (0 / -1e30)
       w_ref:    [3, P, 3P]  bf16  per-layer fused slabs:
                                   cols [0,P)      bn_scale * W_src (padded)
                                   cols [P,2P)     bn_scale * W_lin (padded)
                                   cols [2P,2P+H)  folded dst attention logits
                                   cols [2P+H,2P+2H) folded src attention logits
                                   slab 2: fc_out weights in cols [0,P)
       b_ref:    [3, P]      f32   folded biases (BN shift + GAT/Linear biases,
                                   fc bias in row 2), zero-padded
       o_ref:    [N, P]      f32   lane-dense output (cols >= num_classes are 0)
    """
    # Small at demo N; hoisted out of both layers and all heads.
    mask = mask_ref[...].astype(jnp.float32)                        # [N, N]

    # Head-column selectors generated in-kernel (no DMA input): lane k belongs
    # to head h iff h*C <= k < (h+1)*C; padding lanes (>= H*C) match no head.
    lane = jax.lax.broadcasted_iota(jnp.int32, (1, P), 1)           # [1, P]
    sels = [((lane >= h * C) & (lane < (h + 1) * C)).astype(jnp.bfloat16)
            for h in range(H)]

    def gat_block(xb, layer):
        # One fused MXU push: [ bn*W_src | bn*W_lin | attention-logit cols ].
        w = w_ref[layer]                                            # [P, 3P] bf16
        y = jnp.dot(xb, w, preferred_element_type=jnp.float32)      # [N, 3P] f32

        xs_b = y[:, :P].astype(jnp.bfloat16)                        # src projection
        out = y[:, P:2 * P] + b_ref[layer:layer + 1, :]             # lin skip + bias

        # Logit terms live in the third 128-lane block: [dst H | src H | 0...].
        # dst term needs nodes on sublanes (as produced); src term needs nodes
        # on lanes -> one small XLU transpose of the lane-aligned block.
        att_t = jnp.transpose(y[:, 2 * P:3 * P])                    # [P, N]

        for h in range(H):                                          # static unroll
            d = y[:, 2 * P + h:2 * P + h + 1]                       # [N, 1] dst
            s = att_t[H + h:H + h + 1, :]                           # [1, N] src
            e = d + s                                               # [N, N]
            e = jnp.where(e > 0.0, e, 0.2 * e)                      # LeakyReLU(0.2)
            e = e + mask                                            # -1e30 off-edge
            # Masked softmax over incoming edges (lane axis).
            e = e - jnp.max(e, axis=-1, keepdims=True)
            p = jnp.exp(e)
            attn = p * pl.reciprocal(jnp.sum(p, axis=-1, keepdims=True),
                                     approx=True)
            # Aggregate: pre-mask xs with this head's column selector (bf16) and
            # accumulate the lane-dense [N,N]@[N,P] matmul straight into `out`.
            out = out + jnp.dot(attn.astype(jnp.bfloat16), xs_b * sels[h],
                                preferred_element_type=jnp.float32)

        # BN scale/shift and both biases are pre-folded; Dropout is identity
        # in eval mode.  bf16 for the next layer's MXU push.
        return jnp.maximum(out, 0.0).astype(jnp.bfloat16)

    h1 = gat_block(x_ref[...], 0)
    h2 = gat_block(h1, 1)

    # fc_out fused into the same kernel; weights live in slab 2, cols [0, P).
    wfc = w_ref[2, :, :P]                                           # [P, P] bf16
    o_ref[...] = (jnp.dot(h2, wfc, preferred_element_type=jnp.float32)
                  + b_ref[2:3, :])


# ----------------------------------------------------------------------------
# Wrapper (all casting / padding / folding happens at construction time)
# ----------------------------------------------------------------------------
_VMEM = pl.BlockSpec(memory_space=pltpu.MemorySpace.VMEM)


def net2_forward(x_pad, mask_bf, w_slab, b_slab, *, H, C, num_classes):
    N = x_pad.shape[0]
    kernel = functools.partial(_net2_kernel, H=H, C=C)
    out = pl.pallas_call(
        kernel,
        out_shape=jax.ShapeDtypeStruct((N, P), jnp.float32),
        in_specs=[_VMEM] * 4,
        out_specs=_VMEM,
    )(x_pad, mask_bf, w_slab, b_slab)
    return out[:, :num_classes]       # drop lane padding after the call


# ----------------------------------------------------------------------------
# Deterministic synthetic parameters + host-side algebraic folds
# ----------------------------------------------------------------------------
def make_layer_params(key, fin, hidden_dim, heads):
    HC = hidden_dim * heads
    ks = jax.random.split(key, 8)
    s = 0.1
    return {
        "w_src":   s * jax.random.normal(ks[0], (fin, HC), jnp.float32),
        "w_dst":   s * jax.random.normal(ks[1], (fin, HC), jnp.float32),
        "att_src": s * jax.random.normal(ks[2], (heads, hidden_dim), jnp.float32),
        "att_dst": s * jax.random.normal(ks[3], (heads, hidden_dim), jnp.float32),
        "b_gat":   s * jax.random.normal(ks[4], (1, HC), jnp.float32),
        "w_lin":   s * jax.random.normal(ks[5], (fin, HC), jnp.float32),
        "b_lin":   s * jax.random.normal(ks[6], (1, HC), jnp.float32),
        # BatchNorm1d eval mode (running_mean=0, running_var=1) folded:
        # scale = gamma / sqrt(var + eps), shift = beta - mean * scale
        "bn_scale": (1.0 + 0.05 * jax.random.normal(ks[7], (1, HC), jnp.float32))
                    / jnp.sqrt(1.0 + 1e-5),
        "bn_shift": jnp.full((1, HC), 0.01, jnp.float32),
    }


def fold_layer_params(p, heads, hidden_dim):
    """Host folds: BN + biases into weights, attention vectors folded into
    extra w_cat columns, everything zero-padded to lane-dense 128 blocks."""
    H, C = heads, hidden_dim
    HC = H * C
    fin = p["w_src"].shape[0]
    scale = p["bn_scale"]                                             # [1, HC]

    # Attention-logit columns (UNscaled weights: attention precedes BN):
    # col h = sum_c W_{src,dst}[:, h*C + c] * att_{src,dst}[h, c]
    w_src_h = p["w_src"].reshape(fin, H, C)
    w_dst_h = p["w_dst"].reshape(fin, H, C)
    col_att_dst = jnp.einsum('fhc,hc->fh', w_dst_h, p["att_dst"])     # [fin, H]
    col_att_src = jnp.einsum('fhc,hc->fh', w_src_h, p["att_src"])     # [fin, H]

    w_cat = jnp.zeros((P, 3 * P), jnp.float32)
    w_cat = w_cat.at[:fin, :HC].set(p["w_src"] * scale)               # agg path
    w_cat = w_cat.at[:fin, P:P + HC].set(p["w_lin"] * scale)          # lin skip
    w_cat = w_cat.at[:fin, 2 * P:2 * P + H].set(col_att_dst)          # dst logits
    w_cat = w_cat.at[:fin, 2 * P + H:2 * P + 2 * H].set(col_att_src)  # src logits

    bias = jnp.zeros((P,), jnp.float32)
    bias = bias.at[:HC].set(
        (((p["b_gat"] + p["b_lin"]) * scale) + p["bn_shift"])[0])
    return w_cat, bias


if __name__ == "__main__":
    # Small shapes: N=16 nodes, in_features=8, hidden_dim=8, heads=4, classes=4
    N, FIN = 16, 8
    HIDDEN, HEADS = 8, 4
    NUM_CLASSES = 4
    HC = HIDDEN * HEADS

    key = jax.random.PRNGKey(0)
    k_x, k_e, k_p0, k_p1, k_fc = jax.random.split(key, 5)

    # Node features and a random directed edge set (edge_index[0]=src, [1]=dst).
    x = jax.random.normal(k_x, (N, FIN), jnp.float32)
    E = 48
    src = jax.random.randint(k_e, (E,), 0, N)
    dst = jax.random.randint(jax.random.fold_in(k_e, 1), (E,), 0, N)

    # Dense adjacency adj[dst, src] = 1 plus self-loops -> additive softmax mask.
    adj = jnp.zeros((N, N), jnp.float32).at[dst, src].set(1.0)
    adj = jnp.maximum(adj, jnp.eye(N, dtype=jnp.float32))
    mask_add = jnp.where(adj > 0, 0.0, -1e30)

    raw0 = make_layer_params(k_p0, FIN, HIDDEN, HEADS)
    raw1 = make_layer_params(k_p1, HC, HIDDEN, HEADS)
    w1_cat, b1 = fold_layer_params(raw0, HEADS, HIDDEN)
    w2_cat, b2 = fold_layer_params(raw1, HEADS, HIDDEN)

    fc_w = 0.1 * jax.random.normal(k_fc, (HC, NUM_CLASSES), jnp.float32)
    fc_b = 0.1 * jax.random.normal(jax.random.fold_in(k_fc, 1),
                                   (1, NUM_CLASSES), jnp.float32)
    wfc_slab = jnp.zeros((P, 3 * P), jnp.float32).at[:HC, :NUM_CLASSES].set(fc_w)
    bfc = jnp.zeros((P,), jnp.float32).at[:NUM_CLASSES].set(fc_b[0])

    # --- construction-time packing / casting (nothing is cast per call) -----
    w_slab = jnp.stack([w1_cat, w2_cat, wfc_slab]).astype(jnp.bfloat16)  # [3,P,3P]
    b_slab = jnp.stack([b1, b2, bfc]).astype(jnp.float32)                # [3,P]
    x_pad = (jnp.zeros((N, P), jnp.float32).at[:, :FIN].set(x)
             ).astype(jnp.bfloat16)                                      # [N,P]
    mask_bf = mask_add.astype(jnp.bfloat16)                              # [N,N]

    out = net2_forward(x_pad, mask_bf, w_slab, b_slab,
                       H=HEADS, C=HIDDEN, num_classes=NUM_CLASSES)
    out = jax.block_until_ready(out)
    assert out.shape == (N, NUM_CLASSES), out.shape
    assert bool(jnp.all(jnp.isfinite(out)))
    print("KERNEL_OK")
</pallas_src>

<mosaic_0001>
module attributes {stable_mosaic.version = 11 : i64} {
  func.func @_net2_kernel(%arg0: memref<16x128xbf16, #tpu.memory_space<vmem>>, %arg1: memref<16x16xbf16, #tpu.memory_space<vmem>>, %arg2: memref<3x128x384xbf16, #tpu.memory_space<vmem>>, %arg3: memref<3x128xf32, #tpu.memory_space<vmem>>, %arg4: memref<16x128xf32, #tpu.memory_space<vmem>>) attributes {dimension_semantics = [], scalar_prefetch = 0 : i64, scratch_operands = 0 : i64, tpu.core_type = #tpu.core_type<tc>} {
    %c0 = arith.constant 0 : index
    %c0_0 = arith.constant 0 : index
    %0 = vector.load %arg1[%c0, %c0_0] : memref<16x16xbf16, #tpu.memory_space<vmem>>, vector<16x16xbf16>
    %1 = arith.extf %0 : vector<16x16xbf16> to vector<16x16xf32>
    %2 = tpu.iota {dimensions = array<i32: 1>} : vector<1x128xi32>
    %c0_i32 = arith.constant 0 : i32
    %3 = vector.broadcast %c0_i32 : i32 to vector<1x128xi32>
    %4 = arith.cmpi sge, %2, %3 : vector<1x128xi32>
    %c8_i32 = arith.constant 8 : i32
    %5 = vector.broadcast %c8_i32 : i32 to vector<1x128xi32>
    %6 = arith.cmpi slt, %2, %5 : vector<1x128xi32>
    %7 = arith.andi %4, %6 : vector<1x128xi1>
    %8 = arith.extui %7 : vector<1x128xi1> to vector<1x128xi32>
    %9 = arith.sitofp %8 : vector<1x128xi32> to vector<1x128xf32>
    %10 = arith.truncf %9 : vector<1x128xf32> to vector<1x128xbf16>
    %c8_i32_1 = arith.constant 8 : i32
    %11 = vector.broadcast %c8_i32_1 : i32 to vector<1x128xi32>
    %12 = arith.cmpi sge, %2, %11 : vector<1x128xi32>
    %c16_i32 = arith.constant 16 : i32
    %13 = vector.broadcast %c16_i32 : i32 to vector<1x128xi32>
    %14 = arith.cmpi slt, %2, %13 : vector<1x128xi32>
    %15 = arith.andi %12, %14 : vector<1x128xi1>
    %16 = arith.extui %15 : vector<1x128xi1> to vector<1x128xi32>
    %17 = arith.sitofp %16 : vector<1x128xi32> to vector<1x128xf32>
    %18 = arith.truncf %17 : vector<1x128xf32> to vector<1x128xbf16>
    %c16_i32_2 = arith.constant 16 : i32
    %19 = vector.broadcast %c16_i32_2 : i32 to vector<1x128xi32>
    %20 = arith.cmpi sge, %2, %19 : vector<1x128xi32>
    %c24_i32 = arith.constant 24 : i32
    %21 = vector.broadcast %c24_i32 : i32 to vector<1x128xi32>
    %22 = arith.cmpi slt, %2, %21 : vector<1x128xi32>
    %23 = arith.andi %20, %22 : vector<1x128xi1>
    %24 = arith.extui %23 : vector<1x128xi1> to vector<1x128xi32>
    %25 = arith.sitofp %24 : vector<1x128xi32> to vector<1x128xf32>
    %26 = arith.truncf %25 : vector<1x128xf32> to vector<1x128xbf16>
    %c24_i32_3 = arith.constant 24 : i32
    %27 = vector.broadcast %c24_i32_3 : i32 to vector<1x128xi32>
    %28 = arith.cmpi sge, %2, %27 : vector<1x128xi32>
    %c32_i32 = arith.constant 32 : i32
    %29 = vector.broadcast %c32_i32 : i32 to vector<1x128xi32>
    %30 = arith.cmpi slt, %2, %29 : vector<1x128xi32>
    %31 = arith.andi %28, %30 : vector<1x128xi1>
    %32 = arith.extui %31 : vector<1x128xi1> to vector<1x128xi32>
    %33 = arith.sitofp %32 : vector<1x128xi32> to vector<1x128xf32>
    %34 = arith.truncf %33 : vector<1x128xf32> to vector<1x128xbf16>
    %c0_4 = arith.constant 0 : index
    %c0_5 = arith.constant 0 : index
    %35 = vector.load %arg0[%c0_4, %c0_5] : memref<16x128xbf16, #tpu.memory_space<vmem>>, vector<16x128xbf16>
    %c0_6 = arith.constant 0 : index
    %c0_7 = arith.constant 0 : index
    %c0_8 = arith.constant 0 : index
    %36 = vector.load %arg2[%c0_6, %c0_7, %c0_8] : memref<3x128x384xbf16, #tpu.memory_space<vmem>>, vector<1x128x384xbf16>
    %37 = vector.shape_cast %36 : vector<1x128x384xbf16> to vector<128x384xbf16>
    %cst = arith.constant dense<0.000000e+00> : vector<16x384xf32>
    %38 = tpu.matmul %35, %37, %cst {dimension_numbers = #tpu.dot_dimension_numbers<[1], [0], [0], [1], [0, 0, 1, 1], [], []>} : vector<16x128xbf16>, vector<128x384xbf16>, vector<16x384xf32> -> vector<16x384xf32>
    %39 = vector.extract_strided_slice %38 {offsets = [0, 0], sizes = [16, 128], strides = [1, 1]} : vector<16x384xf32> to vector<16x128xf32>
    %40 = arith.truncf %39 : vector<16x128xf32> to vector<16x128xbf16>
    %41 = vector.extract_strided_slice %38 {offsets = [0, 128], sizes = [16, 128], strides = [1, 1]} : vector<16x384xf32> to vector<16x128xf32>
    %c0_9 = arith.constant 0 : index
    %c0_10 = arith.constant 0 : index
    %42 = vector.load %arg3[%c0_9, %c0_10] : memref<3x128xf32, #tpu.memory_space<vmem>>, vector<1x128xf32>
    %43 = vector.broadcast %42 : vector<1x128xf32> to vector<16x128xf32>
    %44 = arith.addf %41, %43 : vector<16x128xf32>
    %45 = vector.extract_strided_slice %38 {offsets = [0, 256], sizes = [16, 128], strides = [1, 1]} : vector<16x384xf32> to vector<16x128xf32>
    %46 = tpu.transpose %45, [1, 0] : vector<16x128xf32> -> vector<128x16xf32>
    %47 = vector.extract_strided_slice %38 {offsets = [0, 256], sizes = [16, 1], strides = [1, 1]} : vector<16x384xf32> to vector<16x1xf32>
    %48 = vector.extract_strided_slice %46 {offsets = [4, 0], sizes = [1, 16], strides = [1, 1]} : vector<128x16xf32> to vector<1x16xf32>
    %49 = vector.broadcast %47 : vector<16x1xf32> to vector<16x16xf32>
    %50 = vector.broadcast %48 : vector<1x16xf32> to vector<16x16xf32>
    %51 = arith.addf %49, %50 : vector<16x16xf32>
    %cst_11 = arith.constant 0.000000e+00 : f32
    %52 = vector.broadcast %cst_11 : f32 to vector<16x16xf32>
    %53 = arith.cmpf ogt, %51, %52 : vector<16x16xf32>
    %cst_12 = arith.constant 2.000000e-01 : f32
    %54 = vector.broadcast %cst_12 : f32 to vector<16x16xf32>
    %55 = arith.mulf %54, %51 : vector<16x16xf32>
    %56 = arith.select %53, %51, %55 : vector<16x16xi1>, vector<16x16xf32>
    %57 = arith.addf %56, %1 : vector<16x16xf32>
    %cst_13 = arith.constant dense<0xFF800000> : vector<16xf32>
    %58 = vector.multi_reduction <maximumf>, %57, %cst_13 [1] : vector<16x16xf32> to vector<16xf32>
    %59 = vector.shape_cast %58 : vector<16xf32> to vector<16x1xf32>
    %60 = vector.broadcast %59 : vector<16x1xf32> to vector<16x16xf32>
    %61 = arith.subf %57, %60 : vector<16x16xf32>
    %62 = math.exp %61 : vector<16x16xf32>
    %cst_14 = arith.constant dense<0.000000e+00> : vector<16xf32>
    %63 = vector.multi_reduction <add>, %62, %cst_14 [1] : vector<16x16xf32> to vector<16xf32>
    %64 = vector.shape_cast %63 : vector<16xf32> to vector<16x1xf32>
    %65 = tpu.reciprocal %64 {approx = true} : vector<16x1xf32> -> vector<16x1xf32>
    %66 = vector.broadcast %65 : vector<16x1xf32> to vector<16x16xf32>
    %67 = arith.mulf %62, %66 : vector<16x16xf32>
    %68 = arith.truncf %67 : vector<16x16xf32> to vector<16x16xbf16>
    %69 = vector.broadcast %10 : vector<1x128xbf16> to vector<16x128xbf16>
    %70 = arith.mulf %40, %69 : vector<16x128xbf16>
    %cst_15 = arith.constant dense<0.000000e+00> : vector<16x128xf32>
    %71 = tpu.matmul %68, %70, %cst_15 {dimension_numbers = #tpu.dot_dimension_numbers<[1], [0], [0], [1], [0, 0, 1, 1], [], []>} : vector<16x16xbf16>, vector<16x128xbf16>, vector<16x128xf32> -> vector<16x128xf32>
    %72 = arith.addf %44, %71 : vector<16x128xf32>
    %73 = vector.extract_strided_slice %38 {offsets = [0, 257], sizes = [16, 1], strides = [1, 1]} : vector<16x384xf32> to vector<16x1xf32>
    %74 = vector.extract_strided_slice %46 {offsets = [5, 0], sizes = [1, 16], strides = [1, 1]} : vector<128x16xf32> to vector<1x16xf32>
    %75 = vector.broadcast %73 : vector<16x1xf32> to vector<16x16xf32>
    %76 = vector.broadcast %74 : vector<1x16xf32> to vector<16x16xf32>
    %77 = arith.addf %75, %76 : vector<16x16xf32>
    %cst_16 = arith.constant 0.000000e+00 : f32
    %78 = vector.broadcast %cst_16 : f32 to vector<16x16xf32>
    %79 = arith.cmpf ogt, %77, %78 : vector<16x16xf32>
    %cst_17 = arith.constant 2.000000e-01 : f32
    %80 = vector.broadcast %cst_17 : f32 to vector<16x16xf32>
    %81 = arith.mulf %80, %77 : vector<16x16xf32>
    %82 = arith.select %79, %77, %81 : vector<16x16xi1>, vector<16x16xf32>
    %83 = arith.addf %82, %1 : vector<16x16xf32>
    %cst_18 = arith.constant dense<0xFF800000> : vector<16xf32>
    %84 = vector.multi_reduction <maximumf>, %83, %cst_18 [1] : vector<16x16xf32> to vector<16xf32>
    %85 = vector.shape_cast %84 : vector<16xf32> to vector<16x1xf32>
    %86 = vector.broadcast %85 : vector<16x1xf32> to vector<16x16xf32>
    %87 = arith.subf %83, %86 : vector<16x16xf32>
    %88 = math.exp %87 : vector<16x16xf32>
    %cst_19 = arith.constant dense<0.000000e+00> : vector<16xf32>
    %89 = vector.multi_reduction <add>, %88, %cst_19 [1] : vector<16x16xf32> to vector<16xf32>
    %90 = vector.shape_cast %89 : vector<16xf32> to vector<16x1xf32>
    %91 = tpu.reciprocal %90 {approx = true} : vector<16x1xf32> -> vector<16x1xf32>
    %92 = vector.broadcast %91 : vector<16x1xf32> to vector<16x16xf32>
    %93 = arith.mulf %88, %92 : vector<16x16xf32>
    %94 = arith.truncf %93 : vector<16x16xf32> to vector<16x16xbf16>
    %95 = vector.broadcast %18 : vector<1x128xbf16> to vector<16x128xbf16>
    %96 = arith.mulf %40, %95 : vector<16x128xbf16>
    %cst_20 = arith.constant dense<0.000000e+00> : vector<16x128xf32>
    %97 = tpu.matmul %94, %96, %cst_20 {dimension_numbers = #tpu.dot_dimension_numbers<[1], [0], [0], [1], [0, 0, 1, 1], [], []>} : vector<16x16xbf16>, vector<16x128xbf16>, vector<16x128xf32> -> vector<16x128xf32>
    %98 = arith.addf %72, %97 : vector<16x128xf32>
    %99 = vector.extract_strided_slice %38 {offsets = [0, 258], sizes = [16, 1], strides = [1, 1]} : vector<16x384xf32> to vector<16x1xf32>
    %100 = vector.extract_strided_slice %46 {offsets = [6, 0], sizes = [1, 16], strides = [1, 1]} : vector<128x16xf32> to vector<1x16xf32>
    %101 = vector.broadcast %99 : vector<16x1xf32> to vector<16x16xf32>
    %102 = vector.broadcast %100 : vector<1x16xf32> to vector<16x16xf32>
    %103 = arith.addf %101, %102 : vector<16x16xf32>
    %cst_21 = arith.constant 0.000000e+00 : f32
    %104 = vector.broadcast %cst_21 : f32 to vector<16x16xf32>
    %105 = arith.cmpf ogt, %103, %104 : vector<16x16xf32>
    %cst_22 = arith.constant 2.000000e-01 : f32
    %106 = vector.broadcast %cst_22 : f32 to vector<16x16xf32>
    %107 = arith.mulf %106, %103 : vector<16x16xf32>
    %108 = arith.select %105, %103, %107 : vector<16x16xi1>, vector<16x16xf32>
    %109 = arith.addf %108, %1 : vector<16x16xf32>
    %cst_23 = arith.constant dense<0xFF800000> : vector<16xf32>
    %110 = vector.multi_reduction <maximumf>, %109, %cst_23 [1] : vector<16x16xf32> to vector<16xf32>
    %111 = vector.shape_cast %110 : vector<16xf32> to vector<16x1xf32>
    %112 = vector.broadcast %111 : vector<16x1xf32> to vector<16x16xf32>
    %113 = arith.subf %109, %112 : vector<16x16xf32>
    %114 = math.exp %113 : vector<16x16xf32>
    %cst_24 = arith.constant dense<0.000000e+00> : vector<16xf32>
    %115 = vector.multi_reduction <add>, %114, %cst_24 [1] : vector<16x16xf32> to vector<16xf32>
    %116 = vector.shape_cast %115 : vector<16xf32> to vector<16x1xf32>
    %117 = tpu.reciprocal %116 {approx = true} : vector<16x1xf32> -> vector<16x1xf32>
    %118 = vector.broadcast %117 : vector<16x1xf32> to vector<16x16xf32>
    %119 = arith.mulf %114, %118 : vector<16x16xf32>
    %120 = arith.truncf %119 : vector<16x16xf32> to vector<16x16xbf16>
    %121 = vector.broadcast %26 : vector<1x128xbf16> to vector<16x128xbf16>
    %122 = arith.mulf %40, %121 : vector<16x128xbf16>
    %cst_25 = arith.constant dense<0.000000e+00> : vector<16x128xf32>
    %123 = tpu.matmul %120, %122, %cst_25 {dimension_numbers = #tpu.dot_dimension_numbers<[1], [0], [0], [1], [0, 0, 1, 1], [], []>} : vector<16x16xbf16>, vector<16x128xbf16>, vector<16x128xf32> -> vector<16x128xf32>
    %124 = arith.addf %98, %123 : vector<16x128xf32>
    %125 = vector.extract_strided_slice %38 {offsets = [0, 259], sizes = [16, 1], strides = [1, 1]} : vector<16x384xf32> to vector<16x1xf32>
    %126 = vector.extract_strided_slice %46 {offsets = [7, 0], sizes = [1, 16], strides = [1, 1]} : vector<128x16xf32> to vector<1x16xf32>
    %127 = vector.broadcast %125 : vector<16x1xf32> to vector<16x16xf32>
    %128 = vector.broadcast %126 : vector<1x16xf32> to vector<16x16xf32>
    %129 = arith.addf %127, %128 : vector<16x16xf32>
    %cst_26 = arith.constant 0.000000e+00 : f32
    %130 = vector.broadcast %cst_26 : f32 to vector<16x16xf32>
    %131 = arith.cmpf ogt, %129, %130 : vector<16x16xf32>
    %cst_27 = arith.constant 2.000000e-01 : f32
    %132 = vector.broadcast %cst_27 : f32 to vector<16x16xf32>
    %133 = arith.mulf %132, %129 : vector<16x16xf32>
    %134 = arith.select %131, %129, %133 : vector<16x16xi1>, vector<16x16xf32>
    %135 = arith.addf %134, %1 : vector<16x16xf32>
    %cst_28 = arith.constant dense<0xFF800000> : vector<16xf32>
    %136 = vector.multi_reduction <maximumf>, %135, %cst_28 [1] : vector<16x16xf32> to vector<16xf32>
    %137 = vector.shape_cast %136 : vector<16xf32> to vector<16x1xf32>
    %138 = vector.broadcast %137 : vector<16x1xf32> to vector<16x16xf32>
    %139 = arith.subf %135, %138 : vector<16x16xf32>
    %140 = math.exp %139 : vector<16x16xf32>
    %cst_29 = arith.constant dense<0.000000e+00> : vector<16xf32>
    %141 = vector.multi_reduction <add>, %140, %cst_29 [1] : vector<16x16xf32> to vector<16xf32>
    %142 = vector.shape_cast %141 : vector<16xf32> to vector<16x1xf32>
    %143 = tpu.reciprocal %142 {approx = true} : vector<16x1xf32> -> vector<16x1xf32>
    %144 = vector.broadcast %143 : vector<16x1xf32> to vector<16x16xf32>
    %145 = arith.mulf %140, %144 : vector<16x16xf32>
    %146 = arith.truncf %145 : vector<16x16xf32> to vector<16x16xbf16>
    %147 = vector.broadcast %34 : vector<1x128xbf16> to vector<16x128xbf16>
    %148 = arith.mulf %40, %147 : vector<16x128xbf16>
    %cst_30 = arith.constant dense<0.000000e+00> : vector<16x128xf32>
    %149 = tpu.matmul %146, %148, %cst_30 {dimension_numbers = #tpu.dot_dimension_numbers<[1], [0], [0], [1], [0, 0, 1, 1], [], []>} : vector<16x16xbf16>, vector<16x128xbf16>, vector<16x128xf32> -> vector<16x128xf32>
    %150 = arith.addf %124, %149 : vector<16x128xf32>
    %cst_31 = arith.constant 0.000000e+00 : f32
    %151 = vector.broadcast %cst_31 : f32 to vector<16x128xf32>
    %152 = arith.maximumf %150, %151 : vector<16x128xf32>
    %153 = arith.truncf %152 : vector<16x128xf32> to vector<16x128xbf16>
    %c1 = arith.constant 1 : index
    %c0_32 = arith.constant 0 : index
    %c0_33 = arith.constant 0 : index
    %154 = vector.load %arg2[%c1, %c0_32, %c0_33] : memref<3x128x384xbf16, #tpu.memory_space<vmem>>, vector<1x128x384xbf16>
    %155 = vector.shape_cast %154 : vector<1x128x384xbf16> to vector<128x384xbf16>
    %cst_34 = arith.constant dense<0.000000e+00> : vector<16x384xf32>
    %156 = tpu.matmul %153, %155, %cst_34 {dimension_numbers = #tpu.dot_dimension_numbers<[1], [0], [0], [1], [0, 0, 1, 1], [], []>} : vector<16x128xbf16>, vector<128x384xbf16>, vector<16x384xf32> -> vector<16x384xf32>
    %157 = vector.extract_strided_slice %156 {offsets = [0, 0], sizes = [16, 128], strides = [1, 1]} : vector<16x384xf32> to vector<16x128xf32>
    %158 = arith.truncf %157 : vector<16x128xf32> to vector<16x128xbf16>
    %159 = vector.extract_strided_slice %156 {offsets = [0, 128], sizes = [16, 128], strides = [1, 1]} : vector<16x384xf32> to vector<16x128xf32>
    %c1_35 = arith.constant 1 : index
    %c0_36 = arith.constant 0 : index
    %160 = vector.load %arg3[%c1_35, %c0_36] : memref<3x128xf32, #tpu.memory_space<vmem>>, vector<1x128xf32>
    %161 = vector.broadcast %160 : vector<1x128xf32> to vector<16x128xf32>
    %162 = arith.addf %159, %161 : vector<16x128xf32>
    %163 = vector.extract_strided_slice %156 {offsets = [0, 256], sizes = [16, 128], strides = [1, 1]} : vector<16x384xf32> to vector<16x128xf32>
    %164 = tpu.transpose %163, [1, 0] : vector<16x128xf32> -> vector<128x16xf32>
    %165 = vector.extract_strided_slice %156 {offsets = [0, 256], sizes = [16, 1], strides = [1, 1]} : vector<16x384xf32> to vector<16x1xf32>
    %166 = vector.extract_strided_slice %164 {offsets = [4, 0], sizes = [1, 16], strides = [1, 1]} : vector<128x16xf32> to vector<1x16xf32>
    %167 = vector.broadcast %165 : vector<16x1xf32> to vector<16x16xf32>
    %168 = vector.broadcast %166 : vector<1x16xf32> to vector<16x16xf32>
    %169 = arith.addf %167, %168 : vector<16x16xf32>
    %cst_37 = arith.constant 0.000000e+00 : f32
    %170 = vector.broadcast %cst_37 : f32 to vector<16x16xf32>
    %171 = arith.cmpf ogt, %169, %170 : vector<16x16xf32>
    %cst_38 = arith.constant 2.000000e-01 : f32
    %172 = vector.broadcast %cst_38 : f32 to vector<16x16xf32>
    %173 = arith.mulf %172, %169 : vector<16x16xf32>
    %174 = arith.select %171, %169, %173 : vector<16x16xi1>, vector<16x16xf32>
    %175 = arith.addf %174, %1 : vector<16x16xf32>
    %cst_39 = arith.constant dense<0xFF800000> : vector<16xf32>
    %176 = vector.multi_reduction <maximumf>, %175, %cst_39 [1] : vector<16x16xf32> to vector<16xf32>
    %177 = vector.shape_cast %176 : vector<16xf32> to vector<16x1xf32>
    %178 = vector.broadcast %177 : vector<16x1xf32> to vector<16x16xf32>
    %179 = arith.subf %175, %178 : vector<16x16xf32>
    %180 = math.exp %179 : vector<16x16xf32>
    %cst_40 = arith.constant dense<0.000000e+00> : vector<16xf32>
    %181 = vector.multi_reduction <add>, %180, %cst_40 [1] : vector<16x16xf32> to vector<16xf32>
    %182 = vector.shape_cast %181 : vector<16xf32> to vector<16x1xf32>
    %183 = tpu.reciprocal %182 {approx = true} : vector<16x1xf32> -> vector<16x1xf32>
    %184 = vector.broadcast %183 : vector<16x1xf32> to vector<16x16xf32>
    %185 = arith.mulf %180, %184 : vector<16x16xf32>
    %186 = arith.truncf %185 : vector<16x16xf32> to vector<16x16xbf16>
    %187 = vector.broadcast %10 : vector<1x128xbf16> to vector<16x128xbf16>
    %188 = arith.mulf %158, %187 : vector<16x128xbf16>
    %cst_41 = arith.constant dense<0.000000e+00> : vector<16x128xf32>
    %189 = tpu.matmul %186, %188, %cst_41 {dimension_numbers = #tpu.dot_dimension_numbers<[1], [0], [0], [1], [0, 0, 1, 1], [], []>} : vector<16x16xbf16>, vector<16x128xbf16>, vector<16x128xf32> -> vector<16x128xf32>
    %190 = arith.addf %162, %189 : vector<16x128xf32>
    %191 = vector.extract_strided_slice %156 {offsets = [0, 257], sizes = [16, 1], strides = [1, 1]} : vector<16x384xf32> to vector<16x1xf32>
    %192 = vector.extract_strided_slice %164 {offsets = [5, 0], sizes = [1, 16], strides = [1, 1]} : vector<128x16xf32> to vector<1x16xf32>
    %193 = vector.broadcast %191 : vector<16x1xf32> to vector<16x16xf32>
    %194 = vector.broadcast %192 : vector<1x16xf32> to vector<16x16xf32>
    %195 = arith.addf %193, %194 : vector<16x16xf32>
    %cst_42 = arith.constant 0.000000e+00 : f32
    %196 = vector.broadcast %cst_42 : f32 to vector<16x16xf32>
    %197 = arith.cmpf ogt, %195, %196 : vector<16x16xf32>
    %cst_43 = arith.constant 2.000000e-01 : f32
    %198 = vector.broadcast %cst_43 : f32 to vector<16x16xf32>
    %199 = arith.mulf %198, %195 : vector<16x16xf32>
    %200 = arith.select %197, %195, %199 : vector<16x16xi1>, vector<16x16xf32>
    %201 = arith.addf %200, %1 : vector<16x16xf32>
    %cst_44 = arith.constant dense<0xFF800000> : vector<16xf32>
    %202 = vector.multi_reduction <maximumf>, %201, %cst_44 [1] : vector<16x16xf32> to vector<16xf32>
    %203 = vector.shape_cast %202 : vector<16xf32> to vector<16x1xf32>
    %204 = vector.broadcast %203 : vector<16x1xf32> to vector<16x16xf32>
    %205 = arith.subf %201, %204 : vector<16x16xf32>
    %206 = math.exp %205 : vector<16x16xf32>
    %cst_45 = arith.constant dense<0.000000e+00> : vector<16xf32>
    %207 = vector.multi_reduction <add>, %206, %cst_45 [1] : vector<16x16xf32> to vector<16xf32>
    %208 = vector.shape_cast %207 : vector<16xf32> to vector<16x1xf32>
    %209 = tpu.reciprocal %208 {approx = true} : vector<16x1xf32> -> vector<16x1xf32>
    %210 = vector.broadcast %209 : vector<16x1xf32> to vector<16x16xf32>
    %211 = arith.mulf %206, %210 : vector<16x16xf32>
    %212 = arith.truncf %211 : vector<16x16xf32> to vector<16x16xbf16>
    %213 = vector.broadcast %18 : vector<1x128xbf16> to vector<16x128xbf16>
    %214 = arith.mulf %158, %213 : vector<16x128xbf16>
    %cst_46 = arith.constant dense<0.000000e+00> : vector<16x128xf32>
    %215 = tpu.matmul %212, %214, %cst_46 {dimension_numbers = #tpu.dot_dimension_numbers<[1], [0], [0], [1], [0, 0, 1, 1], [], []>} : vector<16x16xbf16>, vector<16x128xbf16>, vector<16x128xf32> -> vector<16x128xf32>
    %216 = arith.addf %190, %215 : vector<16x128xf32>
    %217 = vector.extract_strided_slice %156 {offsets = [0, 258], sizes = [16, 1], strides = [1, 1]} : vector<16x384xf32> to vector<16x1xf32>
    %218 = vector.extract_strided_slice %164 {offsets = [6, 0], sizes = [1, 16], strides = [1, 1]} : vector<128x16xf32> to vector<1x16xf32>
    %219 = vector.broadcast %217 : vector<16x1xf32> to vector<16x16xf32>
    %220 = vector.broadcast %218 : vector<1x16xf32> to vector<16x16xf32>
    %221 = arith.addf %219, %220 : vector<16x16xf32>
    %cst_47 = arith.constant 0.000000e+00 : f32
    %222 = vector.broadcast %cst_47 : f32 to vector<16x16xf32>
    %223 = arith.cmpf ogt, %221, %222 : vector<16x16xf32>
    %cst_48 = arith.constant 2.000000e-01 : f32
    %224 = vector.broadcast %cst_48 : f32 to vector<16x16xf32>
    %225 = arith.mulf %224, %221 : vector<16x16xf32>
    %226 = arith.select %223, %221, %225 : vector<16x16xi1>, vector<16x16xf32>
    %227 = arith.addf %226, %1 : vector<16x16xf32>
    %cst_49 = arith.constant dense<0xFF800000> : vector<16xf32>
    %228 = vector.multi_reduction <maximumf>, %227, %cst_49 [1] : vector<16x16xf32> to vector<16xf32>
    %229 = vector.shape_cast %228 : vector<16xf32> to vector<16x1xf32>
    %230 = vector.broadcast %229 : vector<16x1xf32> to vector<16x16xf32>
    %231 = arith.subf %227, %230 : vector<16x16xf32>
    %232 = math.exp %231 : vector<16x16xf32>
    %cst_50 = arith.constant dense<0.000000e+00> : vector<16xf32>
    %233 = vector.multi_reduction <add>, %232, %cst_50 [1] : vector<16x16xf32> to vector<16xf32>
    %234 = vector.shape_cast %233 : vector<16xf32> to vector<16x1xf32>
    %235 = tpu.reciprocal %234 {approx = true} : vector<16x1xf32> -> vector<16x1xf32>
    %236 = vector.broadcast %235 : vector<16x1xf32> to vector<16x16xf32>
    %237 = arith.mulf %232, %236 : vector<16x16xf32>
    %238 = arith.truncf %237 : vector<16x16xf32> to vector<16x16xbf16>
    %239 = vector.broadcast %26 : vector<1x128xbf16> to vector<16x128xbf16>
    %240 = arith.mulf %158, %239 : vector<16x128xbf16>
    %cst_51 = arith.constant dense<0.000000e+00> : vector<16x128xf32>
    %241 = tpu.matmul %238, %240, %cst_51 {dimension_numbers = #tpu.dot_dimension_numbers<[1], [0], [0], [1], [0, 0, 1, 1], [], []>} : vector<16x16xbf16>, vector<16x128xbf16>, vector<16x128xf32> -> vector<16x128xf32>
    %242 = arith.addf %216, %241 : vector<16x128xf32>
    %243 = vector.extract_strided_slice %156 {offsets = [0, 259], sizes = [16, 1], strides = [1, 1]} : vector<16x384xf32> to vector<16x1xf32>
    %244 = vector.extract_strided_slice %164 {offsets = [7, 0], sizes = [1, 16], strides = [1, 1]} : vector<128x16xf32> to vector<1x16xf32>
    %245 = vector.broadcast %243 : vector<16x1xf32> to vector<16x16xf32>
    %246 = vector.broadcast %244 : vector<1x16xf32> to vector<16x16xf32>
    %247 = arith.addf %245, %246 : vector<16x16xf32>
    %cst_52 = arith.constant 0.000000e+00 : f32
    %248 = vector.broadcast %cst_52 : f32 to vector<16x16xf32>
    %249 = arith.cmpf ogt, %247, %248 : vector<16x16xf32>
    %cst_53 = arith.constant 2.000000e-01 : f32
    %250 = vector.broadcast %cst_53 : f32 to vector<16x16xf32>
    %251 = arith.mulf %250, %247 : vector<16x16xf32>
    %252 = arith.select %249, %247, %251 : vector<16x16xi1>, vector<16x16xf32>
    %253 = arith.addf %252, %1 : vector<16x16xf32>
    %cst_54 = arith.constant dense<0xFF800000> : vector<16xf32>
    %254 = vector.multi_reduction <maximumf>, %253, %cst_54 [1] : vector<16x16xf32> to vector<16xf32>
    %255 = vector.shape_cast %254 : vector<16xf32> to vector<16x1xf32>
    %256 = vector.broadcast %255 : vector<16x1xf32> to vector<16x16xf32>
    %257 = arith.subf %253, %256 : vector<16x16xf32>
    %258 = math.exp %257 : vector<16x16xf32>
    %cst_55 = arith.constant dense<0.000000e+00> : vector<16xf32>
    %259 = vector.multi_reduction <add>, %258, %cst_55 [1] : vector<16x16xf32> to vector<16xf32>
    %260 = vector.shape_cast %259 : vector<16xf32> to vector<16x1xf32>
    %261 = tpu.reciprocal %260 {approx = true} : vector<16x1xf32> -> vector<16x1xf32>
    %262 = vector.broadcast %261 : vector<16x1xf32> to vector<16x16xf32>
    %263 = arith.mulf %258, %262 : vector<16x16xf32>
    %264 = arith.truncf %263 : vector<16x16xf32> to vector<16x16xbf16>
    %265 = vector.broadcast %34 : vector<1x128xbf16> to vector<16x128xbf16>
    %266 = arith.mulf %158, %265 : vector<16x128xbf16>
    %cst_56 = arith.constant dense<0.000000e+00> : vector<16x128xf32>
    %267 = tpu.matmul %264, %266, %cst_56 {dimension_numbers = #tpu.dot_dimension_numbers<[1], [0], [0], [1], [0, 0, 1, 1], [], []>} : vector<16x16xbf16>, vector<16x128xbf16>, vector<16x128xf32> -> vector<16x128xf32>
    %268 = arith.addf %242, %267 : vector<16x128xf32>
    %cst_57 = arith.constant 0.000000e+00 : f32
    %269 = vector.broadcast %cst_57 : f32 to vector<16x128xf32>
    %270 = arith.maximumf %268, %269 : vector<16x128xf32>
    %271 = arith.truncf %270 : vector<16x128xf32> to vector<16x128xbf16>
    %c2 = arith.constant 2 : index
    %c0_58 = arith.constant 0 : index
    %c0_59 = arith.constant 0 : index
    %272 = vector.load %arg2[%c2, %c0_58, %c0_59] : memref<3x128x384xbf16, #tpu.memory_space<vmem>>, vector<1x128x128xbf16>
    %273 = vector.shape_cast %272 : vector<1x128x128xbf16> to vector<128x128xbf16>
    %cst_60 = arith.constant dense<0.000000e+00> : vector<16x128xf32>
    %274 = tpu.matmul %271, %273, %cst_60 {dimension_numbers = #tpu.dot_dimension_numbers<[1], [0], [0], [1], [0, 0, 1, 1], [], []>} : vector<16x128xbf16>, vector<128x128xbf16>, vector<16x128xf32> -> vector<16x128xf32>
    %c2_61 = arith.constant 2 : index
    %c0_62 = arith.constant 0 : index
    %275 = vector.load %arg3[%c2_61, %c0_62] : memref<3x128xf32, #tpu.memory_space<vmem>>, vector<1x128xf32>
    %276 = vector.broadcast %275 : vector<1x128xf32> to vector<16x128xf32>
    %277 = arith.addf %274, %276 : vector<16x128xf32>
    %c0_63 = arith.constant 0 : index
    %c0_64 = arith.constant 0 : index
    %278 = vector.load %arg4[%c0_63, %c0_64] : memref<16x128xf32, #tpu.memory_space<vmem>>, vector<16x128xf32>
    tpu.vector_store %arg4[%c0_63, %c0_64], %277 {strides = array<i32>} : memref<16x128xf32, #tpu.memory_space<vmem>>, vector<16x128xf32>,
    return
  }
}

</mosaic_0001>

<bundles_post_ra>
// kernel: tpu_custom_call.1
= control target key start
LH: loop header
LB: loop body
LE: loop exit
PB: predicated region body
PF: predicated region fallthrough
CT: control target
= control target key end

     0   :  { %9 = vsyncpa [#allocation3], 0  ;;  %s2311_s0 = inlined_call_operand.hbm [shape: bf16[16,128], index: 0, kind: input, shape index: {}]   ;;  %s2312_s1 = inlined_call_operand.hbm [shape: bf16[16,16], index: 1, kind: input, shape index: {}]   ;;  %s2313_s2 = inlined_call_operand.hbm [shape: bf16[3,128,384], index: 2, kind: input, shape index: {}]   ;;  %s2314_s3 = inlined_call_operand.vmem [shape: f32[3,128], index: 3, kind: input, shape index: {}]   ;;  %s2315_s4 = inlined_call_operand.hbm [shape: f32[16,128], index: 4, kind: output, shape index: {}]  }
   0x1   :  { %10 = vsyncpa [#allocation6], 0 }
   0x2   :  { %11 = vsyncpa [#allocation4], 0  ;;  %s2027_s15 = smov [#allocation5]   ;;  %s2028_s17 = smov [#allocation2]  }
   0x3   :  { %s29_s16 = sshll.u32 %s2027_s15, 4  ;;  %s17_s18 = sshll.u32 %s2028_s17, 4  ;;  %s30_s16 = int_to_ptr.vmem [resolvable:$true] %s29_s16  ;;  %s18_s18 = int_to_ptr.vmem [resolvable:$true] %s17_s18 }
   0x4   :  { %s1949_s19 = scalar_lea.vmem %s30_s16, 128  ;;  %p1954_p1 = scmp.lt.s32.totalorder %s30_s16, %s30_s16 }
   0x5   :  { %p1950_p0 = scmp.ne.s32.totalorder %s30_s16, %s1949_s19  ;;  %p1955_p2 = scmp.lt.s32.totalorder %s1949_s19, %s1949_s19 }
   0x7   :  { %p1956_p3 = por %p1955_p2, %p1954_p1 }
   0x9   :  { %p1957_p4 = pnand %p1956_p3, %p1950_p0 }
   0xb   :  { %1960 = shalt.err (!%p1957_p4)
}
   0xc   :  { %s2029_s20 = smov 64   ;;  %s2030_s21 = smov 4  }
   0xd   :  { %35 = dma.hbm_to_vmem [thread:$0]  %s2312_s1, 128, %s30_s16, [#allocation6], %s2029_s20, %s2029_s20, %s2030_s21  }
   0xe   :  { %s1969_s24 = scalar_lea.vmem %s18_s18, 128  ;;  %p1974_p6 = scmp.lt.s32.totalorder %s18_s18, %s18_s18 }
   0xf   :  { %p1970_p5 = scmp.ne.s32.totalorder %s18_s18, %s1969_s24  ;;  %p1975_p7 = scmp.lt.s32.totalorder %s1969_s24, %s1969_s24 }
  0x11   :  { %p1976_p8 = por %p1975_p7, %p1974_p6 }
  0x13   :  { %p1977_p9 = pnand %p1976_p8, %p1970_p5 }
  0x15   :  { %1980 = shalt.err (!%p1977_p9)
}
  0x16   :  { %23 = dma.hbm_to_vmem [thread:$0]  %s2311_s0, 128, %s18_s18, [#allocation3], %s2029_s20, %s2029_s20, %s2030_s21  }
  0x17   :  { %s2031_s27 = smov [#allocation7]  }
  0x18   :  { %s41_s28 = sshll.u32 %s2031_s27, 4  ;;  %s42_s28 = int_to_ptr.vmem [resolvable:$true] %s41_s28 }
  0x19   :  { %s1989_s29 = scalar_lea.vmem %s42_s28, 9216  ;;  %p1994_p11 = scmp.lt.s32.totalorder %s42_s28, %s42_s28 }
  0x1a   :  { %p1990_p10 = scmp.ne.s32.totalorder %s42_s28, %s1989_s29  ;;  %p1995_p12 = scmp.lt.s32.totalorder %s1989_s29, %s1989_s29 }
  0x1c   :  { %p1996_p13 = por %p1995_p12, %p1994_p11 }
  0x1e   :  { %p1997_p0 = pnand %p1996_p13, %p1990_p10 }
  0x20   :  { %2000 = shalt.err (!%p1997_p0)
}
  0x21   :  { %s2032_s1 = smov 192   ;;  %s2033_s30 = smov 12  }
  0x22   :  { %47 = dma.hbm_to_vmem [thread:$0]  %s2313_s2, 9216, %s42_s28, [#allocation6], %s2032_s1, %s2032_s1, %s2033_s30  }
  0x23   :  { %2021 = dma.done.wait [#allocation3], 128  }
  0x24   :  { %2022 = vsyncadd [#allocation3], 4294967168 }
  0x25   :  { %2023 = dma.done.wait [#allocation6], 9344  }
  0x26   :  { %2024 = vsyncadd [#allocation6], 4294957952  ;;  %v2034_v0 = vmov 0.0   ;;  %vm2035_vm0 = vmmov 0   ;;  %v2036_v1 = vmov 1   ;;  %v2037_v2 = vmov 0  }
  0x27   :  { %1664 = vmatprep.subr.bf16.mxu1 %v2034_v0  ;;  %1680 = vmatprep.mubr.msk.bf16.mxu1 %vm2035_vm0, %v2034_v0  ;;  %v1804_v3 = vld [vmem:[#allocation7 + $0xb0] ss:$12 sps:$4 sm:$0xff]   ;;  %v1805_v4 = vld [vmem:[#allocation7 + $0x98] ss:$12 sps:$4 sm:$0xff]   ;;  %v1806_v5 = vld [vmem:[#allocation7 + $0x80] ss:$12 sps:$4 sm:$0xff]   ;;  %v64_v36 = vlaneseq }
  0x28   :  { %1789 = vset.pattern.permute.xlu1 %v2036_v1  ;;  %1788 = vset.pattern.permute.xlu0 %v2037_v2  ;;  %v1807_v6 = vld [vmem:[#allocation7 + $0x68] ss:$12 sps:$4 sm:$0xff]   ;;  %v1808_v7 = vld [vmem:[#allocation7 + $0x50] ss:$12 sps:$4 sm:$0xff]   ;;  %v1809_v8 = vld [vmem:[#allocation7 + $0x38] ss:$12 sps:$4 sm:$0xff]  }
  0x29   :  { %290 = vmatprep.mubr.bf16.mxu0 %v2037_v2  ;;  %1665 = vmatpush3.bf16.msra.mxu1 %v1804_v3  ;;  %v1810_v9 = vld [vmem:[#allocation7 + $0x20] ss:$12 sps:$4 sm:$0xff]   ;;  %v1811_v10 = vld [vmem:[#allocation7 + $0x8] ss:$12 sps:$4 sm:$0xff]   ;;  %v2038_v15 = vmov 3   ;;  %v2039_v17 = vmov 2  }
  0x2a   :  { %1666 = vmatprep.subr.bf16.mxu1 %v2034_v0  ;;  %v1812_v11 = vld [vmem:[#allocation2] sm:$0xff]   ;;  %v1813_v18 = vld [vmem:[#allocation7 + $0xac] ss:$12 sps:$4 sm:$0xff]   ;;  %v1819_v22 = vld [vmem:[#allocation7 + $0x7c] ss:$12 sps:$4 sm:$0xff]   ;;  %v2102_v38 = vshrl.u32 %v64_v36, 7 }
  0x2b   :  { %v1815_v19 = vld [vmem:[#allocation7 + $0xa8] ss:$12 sps:$4 sm:$0xff]   ;;  %258 = vmatprep.subr.bf16.mxu0 %v1813_v18  ;;  %v1818_v21 = vld [vmem:[#allocation7 + $0x90] ss:$12 sps:$4 sm:$0xff]   ;;  %v1821_v23 = vld [vmem:[#allocation7 + $0x78] ss:$12 sps:$4 sm:$0xff]  }
  0x2c   :  { %v1816_v20 = vld [vmem:[#allocation7 + $0x94] ss:$12 sps:$4 sm:$0xff]   ;;  %259 = vmatpush1.bf16.msra.mxu0 %v1815_v19  ;;  %v1822_v24 = vld [vmem:[#allocation7 + $0x64] ss:$12 sps:$4 sm:$0xff]   ;;  %v1825_v26 = vld [vmem:[#allocation7 + $0x4c] ss:$12 sps:$4 sm:$0xff]  }
  0x2d   :  { %1667 = vmatpush3.bf16.msra.mxu1 %v1805_v4  ;;  %260 = vmatprep.subr.bf16.mxu0 %v1816_v20  ;;  %v1824_v25 = vld [vmem:[#allocation7 + $0x60] ss:$12 sps:$4 sm:$0xff]   ;;  %v1827_v27 = vld [vmem:[#allocation7 + $0x48] ss:$12 sps:$4 sm:$0xff]   ;;  %v1830_v29 = vld [vmem:[#allocation7 + $0x30] ss:$12 sps:$4 sm:$0xff]  }
  0x2e   :  { %1668 = vmatprep.subr.bf16.mxu1 %v2034_v0  ;;  %v1828_v28 = vld [vmem:[#allocation7 + $0x34] ss:$12 sps:$4 sm:$0xff]   ;;  %v1831_v30 = vld [vmem:[#allocation7 + $0x1c] ss:$12 sps:$4 sm:$0xff]   ;;  %v1833_v31 = vld [vmem:[#allocation7 + $0x18] ss:$12 sps:$4 sm:$0xff]  }
  0x2f   :  { %v1834_v32 = vld [vmem:[#allocation7 + $0x4] ss:$12 sps:$4 sm:$0xff]   ;;  %v1836_v33 = vld [vmem:[#allocation7] ss:$12 sps:$4 sm:$0xff]   ;;  %v394_v41 = vsub.s32 4, %v2102_v38  ;;  %v487_v42 = vsub.s32 5, %v2102_v38 }
  0x30   :  { %261 = vmatpush1.bf16.msra.mxu0 %v1818_v21  ;;  %v579_v43 = vsub.s32 6, %v2102_v38  ;;  %v1618_v48 = vld [vmem:[#allocation5] sm:$0xff]   ;;  %v671_v59 = vsub.s32 7, %v2102_v38  ;;  %vm406_vm3 = vcmask 130048   ;;  %s2040_s11 = smov [#allocation8]  }
  0x31   :  { %1669 = vmatpush3.bf16.msra.mxu1 %v1806_v5  ;;  %262 = vmatprep.subr.bf16.mxu0 %v1819_v22  ;;  %v2113_v54 = vunpack.c.h.bf16 %v1618_v48  ;;  %v2115_v55 = vunpack.c.l.bf16 %v1618_v48  ;;  %s1532_s12 = sshll.u32 %s2040_s11, 4  ;;  %s1533_s12 = int_to_ptr.vmem [resolvable:$true] %s1532_s12 }
  0x32   :  { %1670 = vmatprep.subr.bf16.mxu1 %v2034_v0  ;;  %s2001_s13 = scalar_lea.vmem %s1533_s12, 256  ;;  %p2006_p2 = scmp.lt.s32.totalorder %s1533_s12, %s1533_s12 }
  0x33   :  { %p2002_p1 = scmp.ne.s32.totalorder %s1533_s12, %s2001_s13  ;;  %p2007_p3 = scmp.lt.s32.totalorder %s2001_s13, %s2001_s13 }
  0x34   :  { %263 = vmatpush1.bf16.msra.mxu0 %v1821_v23 }
  0x35   :  { %1671 = vmatpush3.bf16.msra.mxu1 %v1807_v6  ;;  %264 = vmatprep.subr.bf16.mxu0 %v1822_v24  ;;  %p2008_p4 = por %p2007_p3, %p2006_p2 }
  0x36   :  { %1672 = vmatprep.subr.bf16.mxu1 %v2034_v0 }
  0x37   :  { %p2009_p5 = pnand %p2008_p4, %p2002_p1 }
  0x38   :  { %265 = vmatpush1.bf16.msra.mxu0 %v1824_v25 }
  0x39   :  { %1673 = vmatpush3.bf16.msra.mxu1 %v1808_v7  ;;  %266 = vmatprep.subr.bf16.mxu0 %v1825_v26 }
  0x3a   :  { %1674 = vmatprep.subr.bf16.mxu1 %v2034_v0 }
  0x3c   :  { %267 = vmatpush1.bf16.msra.mxu0 %v1827_v27 }
  0x3d   :  { %1675 = vmatpush3.bf16.msra.mxu1 %v1809_v8  ;;  %268 = vmatprep.subr.bf16.mxu0 %v1828_v28 }
  0x3e   :  { %1676 = vmatprep.subr.bf16.mxu1 %v2034_v0 }
  0x40   :  { %269 = vmatpush1.bf16.msra.mxu0 %v1830_v29 }
  0x41   :  { %1677 = vmatpush3.bf16.msra.mxu1 %v1810_v9  ;;  %270 = vmatprep.subr.bf16.mxu0 %v1831_v30 }
  0x42   :  { %1678 = vmatprep.subr.bf16.mxu1 %v2034_v0 }
  0x44   :  { %271 = vmatpush1.bf16.msra.mxu0 %v1833_v31 }
  0x45   :  { %1679 = vmatpush3.bf16.msra.mxu1 %v1811_v10  ;;  %272 = vmatprep.subr.bf16.mxu0 %v1834_v32 }
  0x46   :  { %1684 = vmatprep.subr.bf16.mxu1 %v2034_v0 }
  0x48   :  { %1681 = vmatmul.mubr.bf16.vlgmr.msra.gmra.mxu1 %v1812_v11  ;;  %273 = vmatpush1.bf16.msra.mxu0 %v1836_v33 }
  0x49   :  { %1686 = vmatprep.mubr.msk.bf16.mxu1 %vm2035_vm0, %v2034_v0 }
  0x4b   :  { %291 = vmatmul.mubr.bf16.vlgmr.msra.gmra.mxu0 %v1812_v11 }
  0x4c   :  { %949 = vmatprep.mubr.bf16.mxu0 %v2037_v2 }
 0x108   :  { %v335_v12 = vpop.f32.mrf.mxu1 }
 0x109   :  { %478 = vperm.xlu1 %1789, %v335_v12   ;;  %384 = vperm.xlu0 %1788, %v335_v12  }
 0x10a   :  { %v1682_v13 = vpop.f32.mrf.mxu1 }
 0x10c   :  { %v338_v14 = vpop.f32.mrf.mxu1 }
 0x10d   :  { %1791 = vset.pattern.permute.xlu1 %v2038_v15  ;;  %389 = vperm.xlu0 %1788, %v338_v14  }
 0x10e   :  { %662 = vperm.xlu1 %1791, %v335_v12   ;;  %v1683_v16 = vpop.f32.mrf.mxu1 }
 0x111   :  { %1790 = vset.pattern.permute.xlu0 %v2039_v17 }
 0x112   :  { %1792 = vset.pattern.permute.xlu1 %v2036_v1  ;;  %570 = vperm.xlu0 %1790, %v335_v12  }
 0x113   :  { %482 = vperm.xlu1 %1792, %v338_v14  }
 0x116   :  { %1794 = vset.pattern.permute.xlu0 %v2038_v15 }
 0x117   :  { %1793 = vset.pattern.permute.xlu1 %v2039_v17  ;;  %666 = vperm.xlu0 %1794, %v338_v14  }
 0x118   :  { %574 = vperm.xlu1 %1793, %v338_v14  }
 0x11b   :  { %1796 = vset.pattern.permute.xlu0 %v2037_v2 }
 0x141   :  { %350 = vxpose.xlu1.b32.start [1/2] (short) (narrow) %v335_v12, 8 }
 0x145   :  { %351 = vxpose.xlu1.b32.end [2/2] (short) (narrow) %v338_v14, 8 }
 0x163   :  { %1795 = vset.pattern.permute.xlu1 %v2037_v2 }
 0x184   :  { %v479_v34 = vpop.permute.xlu1 %478  ;;  %v385_v39 = vpop.permute.xlu0 %384 }
 0x188   :  { %v390_v44 = vpop.permute.xlu0 %389 }
 0x189   :  { %v663_v35 = vpop.permute.xlu1 %662 }
 0x18d   :  { %v571_v58 = vpop.permute.xlu0 %570 }
 0x18e   :  { %v483_v37 = vpop.permute.xlu1 %482 }
 0x192   :  { %v667_v20 = vpop.permute.xlu0 %666 }
 0x193   :  { %v575_v40 = vpop.permute.xlu1 %574 }
 0x1bd   :  { %v366_v45 = vpop.trf.xlu1 }
 0x1be   :  { %v395_v46 = vrot.slane %v366_v45, %v394_v41  ;;  %v488_v47 = vrot.slane %v366_v45, %v487_v42  ;;  %v580_v49 = vrot.slane %v366_v45, %v579_v43  ;;  %v672_v10 = vrot.slane %v366_v45, %v671_v59 }
 0x1c0   :  { %v396_v50 = vadd.f32 %v395_v46, %v385_v39  ;;  %v397_v51 = vadd.f32 %v395_v46, %v390_v44  ;;  %v489_v52 = vadd.f32 %v488_v47, %v479_v34  ;;  %v490_v53 = vadd.f32 %v488_v47, %v483_v37 }
 0x1c1   :  { %v581_v61 = vadd.f32 %v580_v49, %v571_v58  ;;  %v582_v9 = vadd.f32 %v580_v49, %v575_v40  ;;  %v673_v16 = vadd.f32 %v672_v10, %v663_v35  ;;  %v674_v23 = vadd.f32 %v672_v10, %v667_v20 }
 0x1c2   :  { %vm492_vm1 = vcmp.gt.f32.partialorder %v490_v53, 0.0  ;;  %v494_v56 = vmul.f32 0.2, %v490_v53  ;;  %vm398_vm2 = vcmp.gt.f32.partialorder %v396_v50, 0.0  ;;  %v400_v57 = vmul.f32 0.2, %v396_v50 }
 0x1c3   :  { %vm399_vm4 = vcmp.gt.f32.partialorder %v397_v51, 0.0  ;;  %v401_v60 = vmul.f32 0.2, %v397_v51  ;;  %v493_v2 = vmul.f32 0.2, %v489_v52  ;;  %vm491_vm5 = vcmp.gt.f32.partialorder %v489_v52, 0.0 }
 0x1c4   :  { %v496_v62 = vsel %vm492_vm1, %v490_v53, %v494_v56  ;;  %v402_v63 = vsel %vm398_vm2, %v396_v50, %v400_v57  ;;  %v585_v12 = vmul.f32 0.2, %v581_v61  ;;  %vm583_vm6 = vcmp.gt.f32.partialorder %v581_v61, 0.0 }
 0x1c5   :  { %v498_v3 = vadd.f32 %v2113_v54, %v496_v62  ;;  %v404_v4 = vadd.f32 %v2115_v55, %v402_v63  ;;  %v403_v5 = vsel %vm399_vm4, %v397_v51, %v401_v60  ;;  %v495_v11 = vsel %vm491_vm5, %v489_v52, %v493_v2 }
 0x1c6   :  { %v405_v8 = vadd.f32 %v2113_v54, %v403_v5  ;;  %v497_v14 = vadd.f32 %v2115_v55, %v495_v11  ;;  %v587_v18 = vsel %vm583_vm6, %v581_v61, %v585_v12  ;;  %v586_v19 = vmul.f32 0.2, %v582_v9 }
 0x1c7   :  { %v502_v6 = vsel %vm406_vm3, %v498_v3, -inf  ;;  %v407_v7 = vsel %vm406_vm3, %v404_v4, -inf  ;;  %vm584_vm7 = vcmp.gt.f32.partialorder %v582_v9, 0.0  ;;  %v589_v22 = vadd.f32 %v2115_v55, %v587_v18 }
 0x1c8   :  { %503 = vmax.xlane.f32.xlu1 %v502_v6  ;;  %408 = vmax.xlane.f32.xlu0 %v407_v7  ;;  %v410_v13 = vsel %vm406_vm3, %v405_v8, -inf  ;;  %v499_v21 = vsel %vm406_vm3, %v497_v14, -inf  ;;  %v588_v24 = vsel %vm584_vm7, %v582_v9, %v586_v19  ;;  %v677_v25 = vmul.f32 0.2, %v673_v16 }
 0x1c9   :  { %vm675_vm8 = vcmp.gt.f32.partialorder %v673_v16, 0.0  ;;  %v591_v26 = vsel %vm406_vm3, %v589_v22, -inf  ;;  %v590_v27 = vadd.f32 %v2113_v54, %v588_v24  ;;  %v678_v29 = vmul.f32 0.2, %v674_v23 }
 0x1ca   :  { %v679_v28 = vsel %vm675_vm8, %v673_v16, %v677_v25  ;;  %vm676_vm9 = vcmp.gt.f32.partialorder %v674_v23, 0.0  ;;  %v65_v19 = vand.u32 127, %v64_v36 }
 0x1cb   :  { %v594_v30 = vsel %vm406_vm3, %v590_v27, -inf  ;;  %v681_v31 = vadd.f32 %v2115_v55, %v679_v28  ;;  %v680_v32 = vsel %vm676_vm9, %v674_v23, %v678_v29 }
 0x1cc   :  { %411 = vmax.xlane.f32.xlu0 %v410_v13  ;;  %v682_v34 = vadd.f32 %v2113_v54, %v680_v32  ;;  %v292_v13 = vpop.f32.mrf.mxu0  ;;  %vm67_vm10 = vcmp.lt.s32.totalorder %v65_v19, 8  ;;  %vm72_vm11 = vcmp.ge.s32.totalorder %v65_v19, 8  ;;  %vm73_vm12 = vcmp.lt.s32.totalorder %v65_v19, 16 }
 0x1cd   :  { %v683_v33 = vsel %vm406_vm3, %v681_v31, -inf  ;;  %v1545_v36 = vsel %vm67_vm10, 1.0, %v2034_v0  ;;  %vm74_vm13 = vmand %vm72_vm11, %vm73_vm12  ;;  %vm78_vm14 = vcmp.ge.s32.totalorder %v65_v19, 16  ;;  %vm79_vm15 = vcmp.lt.s32.totalorder %v65_v19, 24 }
 0x1ce   :  { %v686_v35 = vsel %vm406_vm3, %v682_v34, -inf  ;;  %v2151_v18 = vpop.f32.mrf.mxu0  ;;  %vm80_vm1 = vmand %vm78_vm14, %vm79_vm15  ;;  %vm84_vm2 = vcmp.ge.s32.totalorder %v65_v19, 24  ;;  %vm85_vm4 = vcmp.lt.s32.totalorder %v65_v19, 32  ;;  %v1840_v19 = vld [vmem:[#allocation7 + $0x170] ss:$12 sps:$4 sm:$0xff]  }
 0x1cf   :  { %vm86_vm5 = vmand %vm84_vm2, %vm85_vm4 }
 0x1d0   :  { %500 = vmax.xlane.f32.xlu0 %v499_v21  ;;  %v296_v23 = vpop.f32.mrf.mxu0 }
 0x1d1   :  { %v2162_v25 = vpack.c.bf16 %v296_v23, %v292_v13  ;;  %v1844_v23 = vld [vmem:[#allocation7 + $0x158] ss:$12 sps:$4 sm:$0xff]  }
 0x1d4   :  { %592 = vmax.xlane.f32.xlu0 %v591_v26 }
 0x1d8   :  { %595 = vmax.xlane.f32.xlu0 %v594_v30 }
 0x1dc   :  { %684 = vmax.xlane.f32.xlu0 %v683_v33 }
 0x1e0   :  { %687 = vmax.xlane.f32.xlu0 %v686_v35  ;;  %v1546_v35 = vsel %vm74_vm13, 1.0, %v2034_v0 }
 0x251   :  { %v409_v37 = vpop.xlane.xlu0 %408  ;;  %v504_v45 = vpop.xlane.xlu1 %503 }
 0x252   :  { %v413_v39 = vsub.f32 %v404_v4, %v409_v37  ;;  %v506_v48 = vsub.f32 %v498_v3, %v504_v45 }
 0x254   :  { %v415_v40 = vmul.f32 1.442695, %v413_v39  ;;  %v509_v52 = vmul.f32 1.442695, %v506_v48 }
 0x255   :  { %v412_v44 = vpop.xlane.xlu0 %411 }
 0x256   :  { %v414_v46 = vsub.f32 %v405_v8, %v412_v44  ;;  %1877 = vpow2.f32 %v415_v40  ;;  %v2177_v44 = vpack.c.bf16 %v1546_v35, %v1546_v35  ;;  %v1861_v35 = vld [vmem:[#allocation7 + $0xd8] ss:$12 sps:$4 sm:$0xff]  }
 0x258   :  { %v417_v47 = vmul.f32 1.442695, %v414_v46 }
 0x259   :  { %v501_v49 = vpop.xlane.xlu0 %500 }
 0x25a   :  { %1879 = vpow2.f32 %v417_v47  ;;  %v505_v50 = vsub.f32 %v497_v14, %v501_v49  ;;  %v522_v49 = vmul.bf16 %v2162_v25, %v2177_v44 }
 0x25c   :  { %v507_v51 = vmul.f32 1.442695, %v505_v50  ;;  %v1547_v50 = vsel %vm80_vm1, 1.0, %v2034_v0 }
 0x25d   :  { %v593_v53 = vpop.xlane.xlu0 %592 }
 0x25e   :  { %1881 = vpow2.f32 %v507_v51  ;;  %v597_v56 = vsub.f32 %v589_v22, %v593_v53 }
 0x25f   :  { %1883 = vpow2.f32 %v509_v52 }
 0x260   :  { %v599_v57 = vmul.f32 1.442695, %v597_v56 }
 0x261   :  { %v596_v58 = vpop.xlane.xlu0 %595 }
 0x262   :  { %v598_v60 = vsub.f32 %v590_v27, %v596_v58  ;;  %1885 = vpow2.f32 %v599_v57  ;;  %v2167_v27 = vpack.c.bf16 %v1545_v36, %v1545_v36  ;;  %v2187_v57 = vpack.c.bf16 %v1547_v50, %v1547_v50  ;;  %v1851_v36 = vld [vmem:[#allocation7 + $0x124] ss:$12 sps:$4 sm:$0xff]  }
 0x263   :  { %v2136_v61 = vpop.eup %1877 }
 0x264   :  { %v601_v62 = vmul.f32 1.442695, %v598_v60  ;;  %v419_v63 = vsel %vm406_vm3, %v2136_v61, 0.0  ;;  %v430_v30 = vmul.bf16 %v2162_v25, %v2167_v27 }
 0x265   :  { %v685_v2 = vpop.xlane.xlu0 %684  ;;  %420 = vadd.xlane.f32.xlu0 %v419_v63  ;;  %v1548_v63 = vsel %vm86_vm5, 1.0, %v2034_v0 }
 0x266   :  { %v689_v3 = vsub.f32 %v681_v31, %v685_v2  ;;  %1887 = vpow2.f32 %v601_v62  ;;  %1685 = vmatpush3.bf16.msra.mxu1 %v430_v30  ;;  %v614_v62 = vmul.bf16 %v2162_v25, %v2187_v57  ;;  %v1855_v30 = vld [vmem:[#allocation7 + $0x10c] ss:$12 sps:$4 sm:$0xff]  }
 0x267   :  { %v1880_v4 = vpop.eup %1879  ;;  %1690 = vmatprep.subr.bf16.mxu1 %v2034_v0 }
 0x268   :  { %v691_v5 = vmul.f32 1.442695, %v689_v3  ;;  %v422_v6 = vsel %vm406_vm3, %v1880_v4, 0.0 }
 0x269   :  { %v688_v7 = vpop.xlane.xlu0 %687  ;;  %423 = vadd.xlane.f32.xlu0 %v422_v6 }
 0x26a   :  { %1889 = vpow2.f32 %v691_v5  ;;  %v690_v8 = vsub.f32 %v682_v34, %v688_v7 }
 0x26b   :  { %v2141_v9 = vpop.eup %1881 }
 0x26c   :  { %v693_v10 = vmul.f32 1.442695, %v690_v8  ;;  %v511_v11 = vsel %vm406_vm3, %v2141_v9, 0.0  ;;  %v2145_v12 = vpop.eup %1883 }
 0x26d   :  { %512 = vadd.xlane.f32.xlu0 %v511_v11  ;;  %v514_v14 = vsel %vm406_vm3, %v2145_v12, 0.0 }
 0x26e   :  { %1891 = vpow2.f32 %v693_v10 }
 0x26f   :  { %v2149_v16 = vpop.eup %1885 }
 0x270   :  { %v603_v20 = vsel %vm406_vm3, %v2149_v16, 0.0 }
 0x271   :  { %515 = vadd.xlane.f32.xlu0 %v514_v14  ;;  %v1837_v14 = vld [vmem:[#allocation7 + $0x168] ss:$12 sps:$4 sm:$0xff]  }
 0x273   :  { %v2156_v21 = vpop.eup %1887 }
 0x274   :  { %v606_v26 = vsel %vm406_vm3, %v2156_v21, 0.0 }
 0x275   :  { %604 = vadd.xlane.f32.xlu0 %v603_v20  ;;  %v1841_v20 = vld [vmem:[#allocation7 + $0x150] ss:$12 sps:$4 sm:$0xff]  }
 0x277   :  { %v2158_v22 = vpop.eup %1889 }
 0x278   :  { %v695_v24 = vsel %vm406_vm3, %v2158_v22, 0.0 }
 0x279   :  { %696 = vadd.xlane.f32.xlu1 %v695_v24  ;;  %607 = vadd.xlane.f32.xlu0 %v606_v26  ;;  %v1847_v24 = vld [vmem:[#allocation7 + $0x13c] ss:$12 sps:$4 sm:$0xff]   ;;  %v1849_v26 = vld [vmem:[#allocation7 + $0x120] ss:$12 sps:$4 sm:$0xff]  }
 0x27b   :  { %v2169_v28 = vpop.eup %1891 }
 0x27c   :  { %v698_v29 = vsel %vm406_vm3, %v2169_v28, 0.0 }
 0x27d   :  { %699 = vadd.xlane.f32.xlu0 %v698_v29  ;;  %v1853_v29 = vld [vmem:[#allocation7 + $0x108] ss:$12 sps:$4 sm:$0xff]  }
 0x2ee   :  { %v421_v31 = vpop.xlane.xlu0 %420 }
 0x2ef   :  { %1893 = vrcp.f32 %v421_v31  ;;  %v1856_v31 = vld [vmem:[#allocation7 + $0x110] ss:$12 sps:$4 sm:$0xff]  }
 0x2f2   :  { %v424_v32 = vpop.xlane.xlu0 %423 }
 0x2f3   :  { %1895 = vrcp.f32 %v424_v32  ;;  %v1857_v32 = vld [vmem:[#allocation7 + $0xf0] ss:$12 sps:$4 sm:$0xff]  }
 0x2f6   :  { %v513_v33 = vpop.xlane.xlu0 %512 }
 0x2f7   :  { %1897 = vrcp.f32 %v513_v33  ;;  %v1859_v33 = vld [vmem:[#allocation7 + $0xf4] ss:$12 sps:$4 sm:$0xff]  }
 0x2fa   :  { %v516_v34 = vpop.xlane.xlu0 %515 }
 0x2fb   :  { %1899 = vrcp.f32 %v516_v34  ;;  %v1860_v34 = vld [vmem:[#allocation7 + $0xf8] ss:$12 sps:$4 sm:$0xff]  }
 0x2fc   :  { %v1894_v37 = vpop.eup %1893 }
 0x2fd   :  { %v427_v45 = vmul.f32 %v1894_v37, %v2136_v61  ;;  %v1863_v37 = vld [vmem:[#allocation7 + $0xdc] ss:$12 sps:$4 sm:$0xff]  }
 0x2fe   :  { %v605_v39 = vpop.xlane.xlu0 %604 }
 0x2ff   :  { %1901 = vrcp.f32 %v605_v39  ;;  %v1864_v39 = vld [vmem:[#allocation7 + $0xe0] ss:$12 sps:$4 sm:$0xff]  }
 0x300   :  { %v1896_v40 = vpop.eup %1895 }
 0x301   :  { %v428_v46 = vmul.f32 %v1896_v40, %v1880_v4  ;;  %v2198_v4 = vpack.c.bf16 %v1548_v63, %v1548_v63  ;;  %v1865_v40 = vld [vmem:[#allocation7 + $0xc0] ss:$12 sps:$4 sm:$0xff]  }
 0x302   :  { %v608_v47 = vpop.xlane.xlu0 %607  ;;  %v697_v52 = vpop.xlane.xlu1 %696 }
 0x303   :  { %1903 = vrcp.f32 %v608_v47  ;;  %v429_v48 = vpack.c.bf16 %v428_v46, %v427_v45  ;;  %v1867_v45 = vld [vmem:[#allocation7 + $0xc4] ss:$12 sps:$4 sm:$0xff]   ;;  %v1868_v46 = vld [vmem:[#allocation7 + $0xc8] ss:$12 sps:$4 sm:$0xff]  }
 0x304   :  { %v1898_v51 = vpop.eup %1897 }
 0x305   :  { %1687 = vmatmul.mubr.msk.bf16.vlgmr.msra.gmra.mxu1 %vm406_vm3, %v429_v48  ;;  %v519_v58 = vmul.f32 %v1898_v51, %v2141_v9  ;;  %v706_v9 = vmul.bf16 %v2162_v25, %v2198_v4  ;;  %v1848_v25 = vld [vmem:[#allocation7 + $0x140] ss:$12 sps:$4 sm:$0xff]  }
 0x306   :  { %1691 = vmatpush3.bf16.msra.mxu1 %v522_v49  ;;  %v700_v53 = vpop.xlane.xlu0 %699  ;;  %1692 = vmatprep.mubr.msk.bf16.mxu1 %vm2035_vm0, %v2034_v0 }
 0x307   :  { %1905 = vrcp.f32 %v700_v53  ;;  %1696 = vmatprep.subr.bf16.mxu1 %v2034_v0 }
 0x308   :  { %v1900_v56 = vpop.eup %1899  ;;  %1907 = vrcp.f32 %v697_v52 }
 0x309   :  { %v520_v60 = vmul.f32 %v1900_v56, %v2145_v12 }
 0x30b   :  { %v521_v61 = vpack.c.bf16 %v520_v60, %v519_v58  ;;  %v1574_v58 = vld [vmem:[%s2314_s3] ss:$0 sm:$0xff] }
 0x30c   :  { %v1902_v2 = vpop.eup %1901  ;;  %v348_v63 = vadd.f32 %v1574_v58, %v2151_v18 }
 0x30d   :  { %1693 = vmatmul.mubr.msk.bf16.vlgmr.msra.gmra.mxu1 %vm406_vm3, %v521_v61  ;;  %v611_v5 = vmul.f32 %v1902_v2, %v2149_v16  ;;  %v1839_v16 = vld [vmem:[#allocation7 + $0x16c] ss:$12 sps:$4 sm:$0xff]   ;;  %v298_v61 = vpop.f32.mrf.mxu0 }
 0x30e   :  { %1697 = vmatpush3.bf16.msra.mxu1 %v614_v62  ;;  %1698 = vmatprep.mubr.msk.bf16.mxu1 %vm2035_vm0, %v2034_v0 }
 0x30f   :  { %1702 = vmatprep.subr.bf16.mxu1 %v2034_v0  ;;  %917 = vmatprep.subr.bf16.mxu0 %v1839_v16 }
 0x310   :  { %v1904_v3 = vpop.eup %1903  ;;  %918 = vmatpush1.bf16.msra.mxu0 %v1837_v14 }
 0x311   :  { %v612_v6 = vmul.f32 %v1904_v3, %v2156_v21  ;;  %v1843_v21 = vld [vmem:[#allocation7 + $0x154] ss:$12 sps:$4 sm:$0xff]   ;;  %v349_v3 = vadd.f32 %v1574_v58, %v298_v61 }
 0x312   :  { %919 = vmatprep.subr.bf16.mxu0 %v1843_v21 }
 0x313   :  { %v613_v7 = vpack.c.bf16 %v612_v6, %v611_v5 }
 0x314   :  { %v1906_v8 = vpop.eup %1905  ;;  %920 = vmatpush1.bf16.msra.mxu0 %v1841_v20 }
 0x315   :  { %1699 = vmatmul.mubr.msk.bf16.vlgmr.msra.gmra.mxu1 %vm406_vm3, %v613_v7  ;;  %v1908_v10 = vpop.eup %1907  ;;  %v704_v11 = vmul.f32 %v1906_v8, %v2169_v28  ;;  %921 = vmatprep.subr.bf16.mxu0 %v1847_v24  ;;  %v1852_v28 = vld [vmem:[#allocation7 + $0x128] ss:$12 sps:$4 sm:$0xff]  }
 0x316   :  { %1703 = vmatpush3.bf16.msra.mxu1 %v706_v9  ;;  %1704 = vmatprep.mubr.msk.bf16.mxu1 %vm2035_vm0, %v2034_v0  ;;  %v703_v12 = vmul.f32 %v1908_v10, %v2158_v22  ;;  %v1845_v22 = vld [vmem:[#allocation7 + $0x138] ss:$12 sps:$4 sm:$0xff]  }
 0x317   :  { %1708 = vmatprep.subr.bf16.mxu1 %v2034_v0 }
 0x318   :  { %v705_v13 = vpack.c.bf16 %v704_v11, %v703_v12  ;;  %922 = vmatpush1.bf16.msra.mxu0 %v1845_v22 }
 0x319   :  { %923 = vmatprep.subr.bf16.mxu0 %v1851_v36 }
 0x31c   :  { %924 = vmatpush1.bf16.msra.mxu0 %v1849_v26 }
 0x31d   :  { %1705 = vmatmul.mubr.msk.bf16.vlgmr.msra.gmra.mxu1 %vm406_vm3, %v705_v13  ;;  %925 = vmatprep.subr.bf16.mxu0 %v1855_v30 }
 0x31e   :  { %1724 = vmatprep.mubr.msk.bf16.mxu1 %vm2035_vm0, %v2034_v0  ;;  %1709 = vmatpush3.bf16.msra.mxu1 %v1840_v19 }
 0x31f   :  { %1710 = vmatprep.subr.bf16.mxu1 %v2034_v0 }
 0x320   :  { %926 = vmatpush1.bf16.msra.mxu0 %v1853_v29 }
 0x321   :  { %927 = vmatprep.subr.bf16.mxu0 %v1859_v33 }
 0x322   :  { %1711 = vmatpush3.bf16.msra.mxu1 %v1844_v23 }
 0x323   :  { %1712 = vmatprep.subr.bf16.mxu1 %v2034_v0 }
 0x324   :  { %928 = vmatpush1.bf16.msra.mxu0 %v1857_v32 }
 0x325   :  { %929 = vmatprep.subr.bf16.mxu0 %v1863_v37 }
 0x326   :  { %1713 = vmatpush3.bf16.msra.mxu1 %v1848_v25 }
 0x327   :  { %1714 = vmatprep.subr.bf16.mxu1 %v2034_v0 }
 0x328   :  { %930 = vmatpush1.bf16.msra.mxu0 %v1861_v35 }
 0x329   :  { %931 = vmatprep.subr.bf16.mxu0 %v1867_v45 }
 0x32a   :  { %1715 = vmatpush3.bf16.msra.mxu1 %v1852_v28 }
 0x32b   :  { %1716 = vmatprep.subr.bf16.mxu1 %v2034_v0 }
 0x32c   :  { %932 = vmatpush1.bf16.msra.mxu0 %v1865_v40 }
 0x32d   :  { %1728 = vmatprep.subr.bf16.mxu0 %v2034_v0 }
 0x32e   :  { %1717 = vmatpush3.bf16.msra.mxu1 %v1856_v31 }
 0x32f   :  { %1718 = vmatprep.subr.bf16.mxu1 %v2034_v0 }
 0x332   :  { %1719 = vmatpush3.bf16.msra.mxu1 %v1860_v34 }
 0x333   :  { %1720 = vmatprep.subr.bf16.mxu1 %v2034_v0 }
 0x336   :  { %1721 = vmatpush3.bf16.msra.mxu1 %v1864_v39 }
 0x337   :  { %1722 = vmatprep.subr.bf16.mxu1 %v2034_v0 }
 0x33a   :  { %1723 = vmatpush3.bf16.msra.mxu1 %v1868_v46 }
 0x33b   :  { %1734 = vmatprep.subr.bf16.mxu1 %v2034_v0 }
 0x3c5   :  { %v468_v47 = vpop.f32.mrf.mxu1 }
 0x3c6   :  { %v475_v5 = vadd.f32 %v468_v47, %v348_v63 }
 0x3c7   :  { %v1688_v48 = vpop.f32.mrf.mxu1 }
 0x3c9   :  { %v471_v49 = vpop.f32.mrf.mxu1 }
 0x3ca   :  { %v476_v7 = vadd.f32 %v471_v49, %v349_v3 }
 0x3cb   :  { %v1689_v50 = vpop.f32.mrf.mxu1 }
 0x3cd   :  { %v560_v51 = vpop.f32.mrf.mxu1 }
 0x3ce   :  { %v567_v8 = vadd.f32 %v560_v51, %v475_v5 }
 0x3cf   :  { %v1694_v52 = vpop.f32.mrf.mxu1 }
 0x3d1   :  { %v563_v53 = vpop.f32.mrf.mxu1 }
 0x3d2   :  { %v568_v10 = vadd.f32 %v563_v53, %v476_v7 }
 0x3d3   :  { %v1695_v56 = vpop.f32.mrf.mxu1 }
 0x3d5   :  { %v652_v60 = vpop.f32.mrf.mxu1 }
 0x3d6   :  { %v659_v11 = vadd.f32 %v652_v60, %v567_v8 }
 0x3d7   :  { %v1700_v62 = vpop.f32.mrf.mxu1 }
 0x3d9   :  { %v655_v2 = vpop.f32.mrf.mxu1 }
 0x3da   :  { %v660_v13 = vadd.f32 %v655_v2, %v568_v10 }
 0x3db   :  { %v1701_v6 = vpop.f32.mrf.mxu1 }
 0x3dd   :  { %v744_v9 = vpop.f32.mrf.mxu1 }
 0x3de   :  { %v751_v14 = vadd.f32 %v744_v9, %v659_v11 }
 0x3df   :  { %v1706_v12 = vpop.f32.mrf.mxu1 }
 0x3e0   :  { %v753_v21 = vmax.f32 %v751_v14, 0.0 }
 0x3e1   :  { %v747_v16 = vpop.f32.mrf.mxu1 }
 0x3e2   :  { %v752_v19 = vadd.f32 %v747_v16, %v660_v13 }
 0x3e3   :  { %v1707_v20 = vpop.f32.mrf.mxu1 }
 0x3e4   :  { %v754_v23 = vmax.f32 %v752_v19, 0.0 }
 0x3e6   :  { %v755_v22 = vpack.c.bf16 %v754_v23, %v753_v21 }
 0x3e8   :  { %950 = vmatmul.mubr.bf16.vlgmr.msra.gmra.mxu0 %v755_v22  ;;  %1725 = vmatmul.mubr.bf16.vlgmr.msra.gmra.mxu1 %v755_v22 }
 0x3e9   :  { %1730 = vmatprep.mubr.msk.bf16.mxu0 %vm2035_vm0, %v2034_v0  ;;  %1736 = vmatprep.mubr.msk.bf16.mxu1 %vm2035_vm0, %v2034_v0 }
 0x4a8   :  { %v951_v18 = vpop.f32.mrf.mxu0  ;;  %v994_v24 = vpop.f32.mrf.mxu1 }
 0x4a9   :  { %1043 = vperm.xlu1 %1795, %v994_v24  }
 0x4aa   :  { %v2230_v25 = vpop.f32.mrf.mxu0  ;;  %v1726_v26 = vpop.f32.mrf.mxu1 }
 0x4ac   :  { %v955_v36 = vpop.f32.mrf.mxu0  ;;  %v997_v28 = vpop.f32.mrf.mxu1 }
 0x4ad   :  { %v2232_v29 = vpack.c.bf16 %v955_v36, %v951_v18  ;;  %1797 = vset.pattern.permute.xlu1 %v2036_v1  ;;  %1048 = vperm.xlu0 %1796, %v997_v28  }
 0x4ae   :  { %1136 = vperm.xlu1 %1797, %v994_v24   ;;  %v1727_v30 = vpop.f32.mrf.mxu1 }
 0x4af   :  { %v1088_v31 = vmul.bf16 %v2232_v29, %v2167_v27  ;;  %v1180_v32 = vmul.bf16 %v2232_v29, %v2177_v44 }
 0x4b1   :  { %1729 = vmatpush3.bf16.msra.mxu0 %v1088_v31  ;;  %1735 = vmatpush3.bf16.msra.mxu1 %v1180_v32 }
 0x4b2   :  { %1798 = vset.pattern.permute.xlu1 %v2039_v17  ;;  %1740 = vmatprep.subr.bf16.mxu0 %v2034_v0 }
 0x4b3   :  { %1228 = vperm.xlu1 %1798, %v994_v24   ;;  %1746 = vmatprep.subr.bf16.mxu1 %v2034_v0 }
 0x4b4   :  { %1803 = vset.pattern.permute.xlu0 %v2038_v15 }
 0x4b7   :  { %1799 = vset.pattern.permute.xlu1 %v2038_v15 }
 0x4b8   :  { %1320 = vperm.xlu1 %1799, %v994_v24  }
 0x4bc   :  { %1800 = vset.pattern.permute.xlu1 %v2036_v1 }
 0x4bd   :  { %1140 = vperm.xlu1 %1800, %v997_v28  }
 0x4c1   :  { %1801 = vset.pattern.permute.xlu1 %v2039_v17 }
 0x4c2   :  { %1232 = vperm.xlu1 %1801, %v997_v28  }
 0x4c6   :  { %1802 = vset.pattern.permute.xlu1 %v2038_v15 }
 0x4c7   :  { %1324 = vperm.xlu1 %1802, %v997_v28  }
 0x4f0   :  { %1009 = vxpose.xlu1.b32.start [1/2] (short) (narrow) %v994_v24, 8 }
 0x4f4   :  { %1010 = vxpose.xlu1.b32.end [2/2] (short) (narrow) %v997_v28, 8 }
 0x524   :  { %v1044_v27 = vpop.permute.xlu1 %1043 }
 0x528   :  { %v1049_v52 = vpop.permute.xlu0 %1048 }
 0x529   :  { %v1137_v44 = vpop.permute.xlu1 %1136 }
 0x52e   :  { %v1229_v33 = vpop.permute.xlu1 %1228 }
 0x533   :  { %v1321_v34 = vpop.permute.xlu1 %1320 }
 0x538   :  { %v1141_v35 = vpop.permute.xlu1 %1140 }
 0x53d   :  { %v1233_v37 = vpop.permute.xlu1 %1232 }
 0x542   :  { %v1325_v39 = vpop.permute.xlu1 %1324 }
 0x56c   :  { %v1025_v40 = vpop.trf.xlu1 }
 0x56d   :  { %v1054_v1 = vrot.slane %v1025_v40, %v394_v41  ;;  %v1146_v17 = vrot.slane %v1025_v40, %v487_v42  ;;  %v1238_v15 = vrot.slane %v1025_v40, %v579_v43  ;;  %v1330_v45 = vrot.slane %v1025_v40, %v671_v59 }
 0x56f   :  { %v1055_v46 = vadd.f32 %v1054_v1, %v1044_v27  ;;  %v1147_v47 = vadd.f32 %v1146_v17, %v1137_v44  ;;  %v1239_v48 = vadd.f32 %v1238_v15, %v1229_v33  ;;  %v1331_v49 = vadd.f32 %v1330_v45, %v1321_v34 }
 0x570   :  { %v1056_v53 = vadd.f32 %v1054_v1, %v1049_v52  ;;  %v1148_v62 = vadd.f32 %v1146_v17, %v1141_v35  ;;  %v1240_v7 = vadd.f32 %v1238_v15, %v1233_v37  ;;  %v1332_v12 = vadd.f32 %v1330_v45, %v1325_v39 }
 0x571   :  { %vm1057_vm6 = vcmp.gt.f32.partialorder %v1055_v46, 0.0  ;;  %v1059_v50 = vmul.f32 0.2, %v1055_v46  ;;  %vm1149_vm7 = vcmp.gt.f32.partialorder %v1147_v47, 0.0  ;;  %v1151_v51 = vmul.f32 0.2, %v1147_v47 }
 0x572   :  { %vm1241_vm8 = vcmp.gt.f32.partialorder %v1239_v48, 0.0  ;;  %v1243_v41 = vmul.f32 0.2, %v1239_v48  ;;  %v1335_v58 = vmul.f32 0.2, %v1331_v49  ;;  %vm1333_vm9 = vcmp.gt.f32.partialorder %v1331_v49, 0.0 }
 0x573   :  { %v1061_v56 = vsel %vm1057_vm6, %v1055_v46, %v1059_v50  ;;  %v1153_v42 = vsel %vm1149_vm7, %v1147_v47, %v1151_v51  ;;  %v1060_v3 = vmul.f32 0.2, %v1056_v53  ;;  %vm1058_vm10 = vcmp.gt.f32.partialorder %v1056_v53, 0.0 }
 0x574   :  { %v1245_v60 = vsel %vm1241_vm8, %v1239_v48, %v1243_v41  ;;  %v1063_v43 = vadd.f32 %v2115_v55, %v1061_v56  ;;  %v1155_v61 = vadd.f32 %v2115_v55, %v1153_v42  ;;  %v1337_v2 = vsel %vm1333_vm9, %v1331_v49, %v1335_v58 }
 0x575   :  { %v1247_v38 = vadd.f32 %v2115_v55, %v1245_v60  ;;  %v1339_v6 = vadd.f32 %v2115_v55, %v1337_v2  ;;  %v1062_v8 = vsel %vm1058_vm10, %v1056_v53, %v1060_v3  ;;  %v1152_v9 = vmul.f32 0.2, %v1148_v62 }
 0x576   :  { %v1065_v59 = vsel %vm406_vm3, %v1063_v43, -inf  ;;  %v1157_v5 = vsel %vm406_vm3, %v1155_v61, -inf  ;;  %vm1150_vm11 = vcmp.gt.f32.partialorder %v1148_v62, 0.0  ;;  %v1064_v11 = vadd.f32 %v2113_v54, %v1062_v8 }
 0x577   :  { %v1249_v63 = vsel %vm406_vm3, %v1247_v38, -inf  ;;  %1066 = vmax.xlane.f32.xlu0 %v1065_v59  ;;  %v1341_v10 = vsel %vm406_vm3, %v1339_v6, -inf  ;;  %v1154_v13 = vsel %vm1150_vm11, %v1148_v62, %v1152_v9  ;;  %v1244_v14 = vmul.f32 0.2, %v1240_v7 }
 0x578   :  { %1250 = vmax.xlane.f32.xlu1 %v1249_v63  ;;  %vm1242_vm12 = vcmp.gt.f32.partialorder %v1240_v7, 0.0  ;;  %v1068_v16 = vsel %vm406_vm3, %v1064_v11, -inf  ;;  %v1156_v19 = vadd.f32 %v2113_v54, %v1154_v13  ;;  %v1336_v20 = vmul.f32 0.2, %v1332_v12 }
 0x579   :  { %v1246_v55 = vsel %vm1242_vm12, %v1240_v7, %v1244_v14  ;;  %vm1334_vm13 = vcmp.gt.f32.partialorder %v1332_v12, 0.0 }
 0x57a   :  { %v1160_v21 = vsel %vm406_vm3, %v1156_v19, -inf  ;;  %v1248_v23 = vadd.f32 %v2113_v54, %v1246_v55  ;;  %v1338_v22 = vsel %vm1334_vm13, %v1332_v12, %v1336_v20 }
 0x57b   :  { %1158 = vmax.xlane.f32.xlu0 %v1157_v5  ;;  %v1340_v24 = vadd.f32 %v2113_v54, %v1338_v22  ;;  %v1272_v22 = vmul.bf16 %v2232_v29, %v2187_v57 }
 0x57c   :  { %v1252_v18 = vsel %vm406_vm3, %v1248_v23, -inf }
 0x57d   :  { %v1344_v26 = vsel %vm406_vm3, %v1340_v24, -inf }
 0x57f   :  { %1342 = vmax.xlane.f32.xlu0 %v1341_v10 }
 0x583   :  { %1069 = vmax.xlane.f32.xlu0 %v1068_v16 }
 0x587   :  { %1161 = vmax.xlane.f32.xlu0 %v1160_v21 }
 0x58b   :  { %1253 = vmax.xlane.f32.xlu0 %v1252_v18 }
 0x58f   :  { %1345 = vmax.xlane.f32.xlu0 %v1344_v26 }
 0x600   :  { %v1067_v36 = vpop.xlane.xlu0 %1066 }
 0x601   :  { %v1251_v28 = vpop.xlane.xlu1 %1250  ;;  %v1071_v30 = vsub.f32 %v1063_v43, %v1067_v36 }
 0x602   :  { %v1255_v31 = vsub.f32 %v1247_v38, %v1251_v28 }
 0x603   :  { %v1073_v32 = vmul.f32 1.442695, %v1071_v30  ;;  %v1364_v30 = vmul.bf16 %v2232_v29, %v2198_v4  ;;  %v1871_v29 = vld [vmem:[#allocation7 + $0x1f8] ss:$12 sps:$4 sm:$0xff]  }
 0x604   :  { %v1159_v27 = vpop.xlane.xlu0 %1158  ;;  %v1257_v33 = vmul.f32 1.442695, %v1255_v31 }
 0x605   :  { %1909 = vpow2.f32 %v1073_v32  ;;  %v1163_v44 = vsub.f32 %v1155_v61, %v1159_v27  ;;  %v1869_v27 = vld [vmem:[#allocation7 + $0x228] ss:$12 sps:$4 sm:$0xff]  }
 0x607   :  { %v1165_v34 = vmul.f32 1.442695, %v1163_v44 }
 0x608   :  { %v1343_v35 = vpop.xlane.xlu0 %1342 }
 0x609   :  { %1911 = vpow2.f32 %v1165_v34  ;;  %v1347_v37 = vsub.f32 %v1339_v6, %v1343_v35 }
 0x60a   :  { %1913 = vpow2.f32 %v1257_v33 }
 0x60b   :  { %v1349_v39 = vmul.f32 1.442695, %v1347_v37  ;;  %v1870_v37 = vld [vmem:[#allocation7 + $0x210] ss:$12 sps:$4 sm:$0xff]  }
 0x60c   :  { %v1070_v54 = vpop.xlane.xlu0 %1069 }
 0x60d   :  { %1915 = vpow2.f32 %v1349_v39  ;;  %v1072_v40 = vsub.f32 %v1064_v11, %v1070_v54  ;;  %v1872_v39 = vld [vmem:[#allocation7 + $0x1e0] ss:$12 sps:$4 sm:$0xff]   ;;  %v1873_v54 = vld [vmem:[#allocation7 + $0x1c8] ss:$12 sps:$4 sm:$0xff]  }
 0x60f   :  { %v1075_v1 = vmul.f32 1.442695, %v1072_v40  ;;  %v1874_v40 = vld [vmem:[#allocation7 + $0x1b0] ss:$12 sps:$4 sm:$0xff]  }
 0x610   :  { %v1162_v17 = vpop.xlane.xlu0 %1161 }
 0x611   :  { %1917 = vpow2.f32 %v1075_v1  ;;  %v1164_v15 = vsub.f32 %v1156_v19, %v1162_v17  ;;  %v1875_v1 = vld [vmem:[#allocation7 + $0x198] ss:$12 sps:$4 sm:$0xff]   ;;  %v1876_v17 = vld [vmem:[#allocation7 + $0x180] ss:$12 sps:$4 sm:$0xff]  }
 0x612   :  { %v1910_v45 = vpop.eup %1909 }
 0x613   :  { %v1167_v46 = vmul.f32 1.442695, %v1164_v15  ;;  %v1077_v47 = vsel %vm406_vm3, %v1910_v45, 0.0  ;;  %v957_v15 = vpop.f32.mrf.mxu0 }
 0x614   :  { %1078 = vadd.xlane.f32.xlu0 %v1077_v47  ;;  %v1254_v48 = vpop.xlane.xlu0 %1253  ;;  %v1603_v47 = vld [vmem:[%s2314_s3 + $0x1] ss:$0 sm:$0xff] }
 0x615   :  { %1919 = vpow2.f32 %v1167_v46  ;;  %v1256_v49 = vsub.f32 %v1248_v23, %v1254_v48 }
 0x616   :  { %v1912_v50 = vpop.eup %1911 }
 0x617   :  { %v1259_v51 = vmul.f32 1.442695, %v1256_v49  ;;  %v1169_v52 = vsel %vm406_vm3, %v1912_v50, 0.0  ;;  %v1914_v41 = vpop.eup %1913 }
 0x618   :  { %1170 = vadd.xlane.f32.xlu0 %v1169_v52  ;;  %v1346_v53 = vpop.xlane.xlu0 %1345  ;;  %v1261_v60 = vsel %vm406_vm3, %v1914_v41, 0.0  ;;  %v1007_v52 = vadd.f32 %v1603_v47, %v2230_v25 }
 0x619   :  { %1921 = vpow2.f32 %v1259_v51  ;;  %v1348_v56 = vsub.f32 %v1340_v24, %v1346_v53 }
 0x61a   :  { %v1916_v42 = vpop.eup %1915 }
 0x61b   :  { %v1351_v58 = vmul.f32 1.442695, %v1348_v56  ;;  %v1353_v43 = vsel %vm406_vm3, %v1916_v42, 0.0  ;;  %v1008_v56 = vadd.f32 %v1603_v47, %v957_v15 }
 0x61c   :  { %1262 = vadd.xlane.f32.xlu0 %v1261_v60  ;;  %1354 = vadd.xlane.f32.xlu1 %v1353_v43 }
 0x61d   :  { %1923 = vpow2.f32 %v1351_v58 }
 0x61e   :  { %v1918_v38 = vpop.eup %1917 }
 0x61f   :  { %v1080_v59 = vsel %vm406_vm3, %v1918_v38, 0.0 }
 0x620   :  { %1081 = vadd.xlane.f32.xlu0 %v1080_v59 }
 0x622   :  { %v1920_v61 = vpop.eup %1919 }
 0x623   :  { %v1172_v62 = vsel %vm406_vm3, %v1920_v61, 0.0 }
 0x624   :  { %1173 = vadd.xlane.f32.xlu0 %v1172_v62 }
 0x626   :  { %v1922_v63 = vpop.eup %1921 }
 0x627   :  { %v1264_v2 = vsel %vm406_vm3, %v1922_v63, 0.0 }
 0x628   :  { %1265 = vadd.xlane.f32.xlu0 %v1264_v2 }
 0x62a   :  { %v1924_v3 = vpop.eup %1923 }
 0x62b   :  { %v1356_v5 = vsel %vm406_vm3, %v1924_v3, 0.0 }
 0x62c   :  { %1357 = vadd.xlane.f32.xlu0 %v1356_v5 }
 0x69d   :  { %v1079_v6 = vpop.xlane.xlu0 %1078 }
 0x69e   :  { %1925 = vrcp.f32 %v1079_v6 }
 0x6a1   :  { %v1171_v7 = vpop.xlane.xlu0 %1170 }
 0x6a5   :  { %v1263_v8 = vpop.xlane.xlu0 %1262  ;;  %v1355_v11 = vpop.xlane.xlu1 %1354 }
 0x6a9   :  { %v1082_v9 = vpop.xlane.xlu0 %1081 }
 0x6aa   :  { %1927 = vrcp.f32 %v1082_v9 }
 0x6ab   :  { %1929 = vrcp.f32 %v1171_v7  ;;  %v1926_v13 = vpop.eup %1925 }
 0x6ac   :  { %v1085_v19 = vmul.f32 %v1926_v13, %v1910_v45 }
 0x6ad   :  { %v1174_v10 = vpop.xlane.xlu0 %1173 }
 0x6ae   :  { %1931 = vrcp.f32 %v1174_v10 }
 0x6af   :  { %1933 = vrcp.f32 %v1263_v8 }
 0x6b1   :  { %v1266_v12 = vpop.xlane.xlu0 %1265 }
 0x6b2   :  { %1935 = vrcp.f32 %v1266_v12 }
 0x6b3   :  { %1937 = vrcp.f32 %v1355_v11  ;;  %v1608_v11 = vld [vmem:[%s2314_s3 + $0x2] ss:$0 sm:$0xff] }
 0x6b5   :  { %v1358_v14 = vpop.xlane.xlu0 %1357 }
 0x6b6   :  { %1939 = vrcp.f32 %v1358_v14 }
 0x6b7   :  { %v1928_v16 = vpop.eup %1927 }
 0x6b8   :  { %v1086_v55 = vmul.f32 %v1928_v16, %v1918_v38  ;;  %v1930_v20 = vpop.eup %1929 }
 0x6b9   :  { %v1177_v18 = vmul.f32 %v1930_v20, %v1912_v50 }
 0x6ba   :  { %v1087_v21 = vpack.c.bf16 %v1086_v55, %v1085_v19 }
 0x6bb   :  { %v1932_v23 = vpop.eup %1931 }
 0x6bc   :  { %1731 = vmatmul.mubr.msk.bf16.vlgmr.msra.gmra.mxu0 %vm406_vm3, %v1087_v21  ;;  %v1178_v24 = vmul.f32 %v1932_v23, %v1920_v61  ;;  %v1934_v26 = vpop.eup %1933 }
 0x6bd   :  { %1741 = vmatpush3.bf16.msra.mxu0 %v1272_v22  ;;  %1742 = vmatprep.mubr.msk.bf16.mxu0 %vm2035_vm0, %v2034_v0  ;;  %v1269_v31 = vmul.f32 %v1934_v26, %v1914_v41 }
 0x6be   :  { %v1179_v36 = vpack.c.bf16 %v1178_v24, %v1177_v18  ;;  %1752 = vmatprep.subr.bf16.mxu0 %v2034_v0 }
 0x6bf   :  { %v1936_v28 = vpop.eup %1935 }
 0x6c0   :  { %1737 = vmatmul.mubr.msk.bf16.vlgmr.msra.gmra.mxu1 %vm406_vm3, %v1179_v36  ;;  %v1270_v57 = vmul.f32 %v1936_v28, %v1922_v63  ;;  %v1938_v32 = vpop.eup %1937 }
 0x6c1   :  { %1747 = vmatpush3.bf16.msra.mxu1 %v1364_v30  ;;  %1748 = vmatprep.mubr.msk.bf16.mxu1 %vm2035_vm0, %v2034_v0  ;;  %v1361_v34 = vmul.f32 %v1938_v32, %v1916_v42 }
 0x6c2   :  { %v1271_v44 = vpack.c.bf16 %v1270_v57, %v1269_v31 }
 0x6c3   :  { %v1940_v33 = vpop.eup %1939 }
 0x6c4   :  { %v1362_v35 = vmul.f32 %v1940_v33, %v1924_v3  ;;  %1743 = vmatmul.mubr.msk.bf16.vlgmr.msra.gmra.mxu0 %vm406_vm3, %v1271_v44 }
 0x6c5   :  { %1753 = vmatpush3.bf16.msra.mxu0 %v1869_v27  ;;  %1768 = vmatprep.mubr.msk.bf16.mxu0 %vm2035_vm0, %v2034_v0 }
 0x6c6   :  { %v1363_v4 = vpack.c.bf16 %v1362_v35, %v1361_v34  ;;  %1754 = vmatprep.subr.bf16.mxu0 %v2034_v0 }
 0x6c8   :  { %1749 = vmatmul.mubr.msk.bf16.vlgmr.msra.gmra.mxu1 %vm406_vm3, %v1363_v4 }
 0x6c9   :  { %1755 = vmatpush3.bf16.msra.mxu0 %v1870_v37 }
 0x6ca   :  { %1756 = vmatprep.subr.bf16.mxu0 %v2034_v0 }
 0x6cd   :  { %1757 = vmatpush3.bf16.msra.mxu0 %v1871_v29 }
 0x6ce   :  { %1758 = vmatprep.subr.bf16.mxu0 %v2034_v0 }
 0x6d1   :  { %1759 = vmatpush3.bf16.msra.mxu0 %v1872_v39 }
 0x6d2   :  { %1760 = vmatprep.subr.bf16.mxu0 %v2034_v0 }
 0x6d5   :  { %1761 = vmatpush3.bf16.msra.mxu0 %v1873_v54 }
 0x6d6   :  { %1762 = vmatprep.subr.bf16.mxu0 %v2034_v0 }
 0x6d9   :  { %1763 = vmatpush3.bf16.msra.mxu0 %v1874_v40 }
 0x6da   :  { %1764 = vmatprep.subr.bf16.mxu0 %v2034_v0 }
 0x6dd   :  { %1765 = vmatpush3.bf16.msra.mxu0 %v1875_v1 }
 0x6de   :  { %1766 = vmatprep.subr.bf16.mxu0 %v2034_v0 }
 0x6e1   :  { %1767 = vmatpush3.bf16.msra.mxu0 %v1876_v17 }
 0x77c   :  { %v1126_v45 = vpop.f32.mrf.mxu0 }
 0x77d   :  { %v1133_v42 = vadd.f32 %v1126_v45, %v1007_v52 }
 0x77e   :  { %v1732_v46 = vpop.f32.mrf.mxu0 }
 0x780   :  { %v1129_v48 = vpop.f32.mrf.mxu0  ;;  %v1218_v49 = vpop.f32.mrf.mxu1 }
 0x781   :  { %v1134_v60 = vadd.f32 %v1129_v48, %v1008_v56  ;;  %v1225_v43 = vadd.f32 %v1218_v49, %v1133_v42 }
 0x782   :  { %v1733_v50 = vpop.f32.mrf.mxu0  ;;  %v1738_v51 = vpop.f32.mrf.mxu1 }
 0x784   :  { %v1221_v41 = vpop.f32.mrf.mxu1  ;;  %v1310_v53 = vpop.f32.mrf.mxu0 }
 0x785   :  { %v1226_v61 = vadd.f32 %v1221_v41, %v1134_v60  ;;  %v1317_v62 = vadd.f32 %v1310_v53, %v1225_v43 }
 0x786   :  { %v1739_v58 = vpop.f32.mrf.mxu1  ;;  %v1744_v0 = vpop.f32.mrf.mxu0 }
 0x788   :  { %v1313_v38 = vpop.f32.mrf.mxu0  ;;  %v1402_v59 = vpop.f32.mrf.mxu1 }
 0x789   :  { %v1318_v3 = vadd.f32 %v1313_v38, %v1226_v61  ;;  %v1409_v5 = vadd.f32 %v1402_v59, %v1317_v62 }
 0x78a   :  { %v1745_v63 = vpop.f32.mrf.mxu0  ;;  %v1750_v2 = vpop.f32.mrf.mxu1 }
 0x78b   :  { %v1411_v25 = vmax.f32 %v1409_v5, 0.0 }
 0x78c   :  { %v1405_v6 = vpop.f32.mrf.mxu1 }
 0x78d   :  { %v1410_v7 = vadd.f32 %v1405_v6, %v1318_v3 }
 0x78e   :  { %v1751_v8 = vpop.f32.mrf.mxu1 }
 0x78f   :  { %v1412_v9 = vmax.f32 %v1410_v7, 0.0 }
 0x791   :  { %v1413_v10 = vpack.c.bf16 %v1412_v9, %v1411_v25 }
 0x793   :  { %1769 = vmatmul.mubr.bf16.vlgmr.msra.gmra.mxu0 %v1413_v10 }
 0x853   :  { %v1518_v12 = vpop.f32.mrf.mxu0 }
 0x854   :  { %v1519_v13 = vadd.f32 %v1608_v11, %v1518_v12 }
 0x855   :  { %v1770_v14 = vpop.f32.mrf.mxu0 }
 0x856   :  { %1525 = vst [vmem:[#allocation8] sm:$0xff] %v1519_v13 }
 0x857   :  { %v1521_v16 = vpop.f32.mrf.mxu0 }
 0x858   :  { %v1522_v19 = vadd.f32 %v1608_v11, %v1521_v16 }
 0x859   :  { %v1771_v55 = vpop.f32.mrf.mxu0 }
 0x85a   :  { %1526 = vst [vmem:[#allocation8 + $0x8] sm:$0xff] %v1522_v19 }
 0x85b   :  { %2012 = shalt.err (!%p2009_p5)
}
 0x85c   :  { %s2041_s14 = smov 128   ;;  %s2042_s3 = smov 8  }
 0x85d   :  { %1538 = dma.vmem_to_hbm [thread:$0]  %s1533_s12, 256, %s2315_s4, [#allocation4], %s2041_s14, %s2041_s14, %s2042_s3  }
 0x85e   :  { %2025 = dma.done.wait [#allocation4], 256  }
 0x85f   :  { %2026 = vsyncadd [#allocation4], 4294967040 }
 0x860   :  { %1542 = vsyncpa [#allocation3], 1 }
 0x861   :  { %1543 = vsyncpa [#allocation6], 1 }
 0x862   :  { %1544 = vsyncpa [#allocation4], 1 }

</bundles_post_ra>
